<compile_context>
chip_gen: v6e
topology: v6e:2x2x1
jax: 0.10.0
libtpu: 0.0.40
codegen_flags: <defaults>
</compile_context>

<pallas_src>
import functools
import math

import jax
import jax.numpy as jnp
import numpy as np
from jax import lax
from jax.experimental import pallas as pl
from jax.experimental.pallas import tpu as pltpu

_LN_EPS = 1e-5
_INV_SQRT2 = np.float32(1.0 / math.sqrt(2.0))


# -----------------------------------------------------------------------------
# shared math helpers (used by both the kernel and the pure-JAX reference)
# -----------------------------------------------------------------------------
def _erf(z):
    # Abramowitz & Stegun 7.1.26; max abs error ~1.5e-7 (f32-exact).
    a = jnp.abs(z)
    t = 1.0 / (1.0 + 0.3275911 * a)
    poly = t * (0.254829592 + t * (-0.284496736 + t * (1.421413741
               + t * (-1.453152027 + t * 1.061405429))))
    e = 1.0 - poly * jnp.exp(-a * a)
    return jnp.where(z >= 0, e, -e)


def _gelu(x):
    # matches torch.nn.functional.gelu (exact / erf form) to ~1e-7
    return 0.5 * x * (1.0 + _erf(x * _INV_SQRT2))


# -----------------------------------------------------------------------------
# Pallas kernel: full DDSConv stack for one batch element per grid step
# -----------------------------------------------------------------------------
def make_ddsconv_kernel(channels, K, n_layers, T, Tp):
    C = channels
    slack = Tp - T  # width of the all-zero lane tail (x and mask padded with 0)

    def layer_norm_ct(y, gamma, beta):
        # LayerNorm over channels for every time step; y: (C, Tp), gamma/beta: (C, 1)
        mean = jnp.mean(y, axis=0, keepdims=True)
        var = jnp.mean(jnp.square(y - mean), axis=0, keepdims=True)
        return (y - mean) * lax.rsqrt(var + _LN_EPS) * gamma + beta

    def kernel(x_ref, mask_ref, wsep_ref, bsep_ref, w1_ref, b1_ref,
               g1_ref, be1_ref, g2_ref, be2_ref, o_ref):
        x = x_ref[0].astype(jnp.float32)          # (C, Tp)
        mask = mask_ref[0].astype(jnp.float32)    # (1, Tp)
        t_idx = lax.broadcasted_iota(jnp.int32, (1, Tp), 1)

        for i in range(n_layers):                 # static unroll over layers
            d = K ** i
            pad = (K * d - d) // 2
            # If the zero tail is >= pad wide, every rolled tap's wrap-around
            # either reads zeros (head taps) or only lands in dead columns
            # >= T (tail taps) which x*mask / the final mask kill.  Then the
            # explicit edge masks are unnecessary (saves 2 VPU selects/tap).
            need_edge_mask = pad > slack
            xm = x * mask
            ws = wsep_ref[i]                      # (C, K) depthwise taps

            # dilated depthwise conv: K lane rolls (XLU) + per-channel FMAs (VPU)
            acc = jnp.zeros((C, Tp), jnp.float32)
            for j in range(K):
                off = j * d - pad                 # static tap offset
                if off == 0:
                    shifted = xm
                else:
                    shifted = pltpu.roll(xm, shift=(-off) % Tp, axis=1)
                    if need_edge_mask:
                        if off > 0:   # zero the wrapped tail -> zero-padding semantics
                            shifted = jnp.where(t_idx < Tp - off, shifted, 0.0)
                        else:         # zero the wrapped head
                            shifted = jnp.where(t_idx >= -off, shifted, 0.0)
                acc = acc + ws[:, j:j + 1] * shifted
            y = acc + bsep_ref[i]                 # (C, 1) bias broadcast

            y = layer_norm_ct(y, g1_ref[i], be1_ref[i])
            y = _gelu(y)
            # 1x1 conv == channel-mixing matmul on the MXU
            y = jnp.dot(w1_ref[i], y, preferred_element_type=jnp.float32) + b1_ref[i]
            y = layer_norm_ct(y, g2_ref[i], be2_ref[i])
            y = _gelu(y)
            # nn.Dropout(p_dropout=0.0) == identity at inference
            x = x + y

        o_ref[0] = (x * mask).astype(o_ref.dtype)

    return kernel


def dds_conv_forward(x, x_mask, params, *, kernel_size, n_layers, g=None):
    """x: (B, C, T), x_mask: (B, 1, T). Returns (B, C, T). Matches DDSConv.forward."""
    if g is not None:
        x = x + g                                 # pointwise conditioning add
    B, C, T = x.shape
    K = kernel_size
    Tp = max(128, ((T + 127) // 128) * 128)       # lane-dense time axis
    if Tp != T:
        x = jnp.pad(x, ((0, 0), (0, 0), (0, Tp - T)))
        x_mask = jnp.pad(x_mask, ((0, 0), (0, 0), (0, Tp - T)))

    kernel = make_ddsconv_kernel(C, K, n_layers, T, Tp)

    def const_spec(a):                            # grid-invariant weight block
        nd = a.ndim
        return pl.BlockSpec(a.shape, lambda b, _nd=nd: (0,) * _nd)

    in_specs = [
        pl.BlockSpec((1, C, Tp), lambda b: (b, 0, 0)),   # x
        pl.BlockSpec((1, 1, Tp), lambda b: (b, 0, 0)),   # x_mask
        const_spec(params["w_sep"]), const_spec(params["b_sep"]),
        const_spec(params["w_1x1"]), const_spec(params["b_1x1"]),
        const_spec(params["g1"]), const_spec(params["be1"]),
        const_spec(params["g2"]), const_spec(params["be2"]),
    ]

    out = pl.pallas_call(
        kernel,
        out_shape=jax.ShapeDtypeStruct((B, C, Tp), x.dtype),
        grid_spec=pltpu.PrefetchScalarGridSpec(
            num_scalar_prefetch=0,
            grid=(B,),
            in_specs=in_specs,
            out_specs=pl.BlockSpec((1, C, Tp), lambda b: (b, 0, 0)),
        ),
        compiler_params=pltpu.CompilerParams(
            dimension_semantics=("parallel",),
            vmem_limit_bytes=32 * 1024 * 1024,
        ),
    )(x, x_mask, params["w_sep"], params["b_sep"], params["w_1x1"],
      params["b_1x1"], params["g1"], params["be1"], params["g2"], params["be2"])
    return out[:, :, :T]


# -----------------------------------------------------------------------------
# Pure-JAX reference (mirrors the PyTorch module)
# -----------------------------------------------------------------------------
def _depthwise_conv1d(x, w, b, dilation, padding):
    out = lax.conv_general_dilated(
        x, w, window_strides=(1,), padding=[(padding, padding)],
        rhs_dilation=(dilation,), dimension_numbers=("NCH", "OIH", "NCH"),
        feature_group_count=x.shape[1])
    return out + b[None, :, None]


def _layer_norm_ref(x, gamma, beta):
    mean = jnp.mean(x, axis=1, keepdims=True)
    var = jnp.mean(jnp.square(x - mean), axis=1, keepdims=True)
    return ((x - mean) * lax.rsqrt(var + _LN_EPS)
            * gamma[None, :, None] + beta[None, :, None])


def dds_conv_ref(x, x_mask, p, *, kernel_size, n_layers, g=None):
    if g is not None:
        x = x + g
    K = kernel_size
    for i in range(n_layers):
        d = K ** i
        pad = (K * d - d) // 2
        y = _depthwise_conv1d(x * x_mask, p["w_sep"][i][:, None, :],
                              p["b_sep"][i, :, 0], d, pad)
        y = _layer_norm_ref(y, p["g1"][i, :, 0], p["be1"][i, :, 0])
        y = _gelu(y)
        y = jnp.einsum("oc,bct->bot", p["w_1x1"][i], y) + p["b_1x1"][i][None]
        y = _layer_norm_ref(y, p["g2"][i, :, 0], p["be2"][i, :, 0])
        y = _gelu(y)
        x = x + y
    return x * x_mask


# -----------------------------------------------------------------------------
# Deterministic parameter init (shapes from DDSConv.__init__)
# -----------------------------------------------------------------------------
def init_params(key, channels, K, n_layers):
    ks = jax.random.split(key, 8)
    s = 0.3
    w_sep = jax.random.normal(ks[0], (n_layers, channels, K), jnp.float32) * s
    b_sep = jax.random.normal(ks[1], (n_layers, channels, 1), jnp.float32) * s
    w_1x1 = jax.random.normal(ks[2], (n_layers, channels, channels), jnp.float32) * s
    b_1x1 = jax.random.normal(ks[3], (n_layers, channels, 1), jnp.float32) * s
    # torch initializes LayerNorm gamma=1, beta=0; perturb so the affine path is exercised.
    g1 = 1.0 + 0.2 * jax.random.normal(ks[4], (n_layers, channels, 1), jnp.float32)
    be1 = 0.2 * jax.random.normal(ks[5], (n_layers, channels, 1), jnp.float32)
    g2 = 1.0 + 0.2 * jax.random.normal(ks[6], (n_layers, channels, 1), jnp.float32)
    be2 = 0.2 * jax.random.normal(ks[7], (n_layers, channels, 1), jnp.float32)
    return dict(w_sep=w_sep, b_sep=b_sep, w_1x1=w_1x1, b_1x1=b_1x1,
                g1=g1, be1=be1, g2=g2, be2=be2)


if __name__ == "__main__":
    B = 2
    channels = 4
    kernel_size = 3
    n_layers = 3
    T = 16

    key = jax.random.PRNGKey(0)
    k_x, k_p = jax.random.split(key)
    x = jax.random.normal(k_x, (B, channels, T), jnp.float32)
    lengths = jnp.array([T, T - 4])
    x_mask = (jnp.arange(T)[None, :] < lengths[:, None]).astype(jnp.float32)[:, None, :]

    params = init_params(k_p, channels, kernel_size, n_layers)

    fwd = functools.partial(dds_conv_forward, kernel_size=kernel_size,
                            n_layers=n_layers)
    y = jax.jit(lambda a, m: fwd(a, m, params))(x, x_mask)
    y = jax.block_until_ready(y)

    y_ref = dds_conv_ref(x, x_mask, params, kernel_size=kernel_size,
                         n_layers=n_layers)
    np.testing.assert_allclose(np.asarray(y), np.asarray(y_ref),
                               rtol=1e-5, atol=1e-5)
    print("KERNEL_OK")
</pallas_src>

<mosaic_0001>
module attributes {stable_mosaic.version = 11 : i64} {
  func.func @kernel(%arg0: i32, %arg1: memref<1x4x128xf32, #tpu.memory_space<vmem>>, %arg2: memref<1x1x128xf32, #tpu.memory_space<vmem>>, %arg3: memref<3x4x3xf32, #tpu.memory_space<vmem>>, %arg4: memref<3x4x1xf32, #tpu.memory_space<vmem>>, %arg5: memref<3x4x4xf32, #tpu.memory_space<vmem>>, %arg6: memref<3x4x1xf32, #tpu.memory_space<vmem>>, %arg7: memref<3x4x1xf32, #tpu.memory_space<vmem>>, %arg8: memref<3x4x1xf32, #tpu.memory_space<vmem>>, %arg9: memref<3x4x1xf32, #tpu.memory_space<vmem>>, %arg10: memref<3x4x1xf32, #tpu.memory_space<vmem>>, %arg11: memref<1x4x128xf32, #tpu.memory_space<vmem>>) attributes {dimension_semantics = [#tpu.dimension_semantics<parallel>], iteration_bounds = array<i64: 2>, scalar_prefetch = 0 : i64, scratch_operands = 0 : i64, tpu.core_type = #tpu.core_type<tc>, window_params = [{transform_indices = @transform_0, window_bounds = array<i64: 1, 4, 128>}, {transform_indices = @transform_1, window_bounds = array<i64: 1, 1, 128>}, {pipeline_mode = #tpu.pipeline_mode<synchronous>, transform_indices = @transform_2, window_bounds = array<i64: 3, 4, 3>}, {pipeline_mode = #tpu.pipeline_mode<synchronous>, transform_indices = @transform_3, window_bounds = array<i64: 3, 4, 1>}, {pipeline_mode = #tpu.pipeline_mode<synchronous>, transform_indices = @transform_4, window_bounds = array<i64: 3, 4, 4>}, {pipeline_mode = #tpu.pipeline_mode<synchronous>, transform_indices = @transform_5, window_bounds = array<i64: 3, 4, 1>}, {pipeline_mode = #tpu.pipeline_mode<synchronous>, transform_indices = @transform_6, window_bounds = array<i64: 3, 4, 1>}, {pipeline_mode = #tpu.pipeline_mode<synchronous>, transform_indices = @transform_7, window_bounds = array<i64: 3, 4, 1>}, {pipeline_mode = #tpu.pipeline_mode<synchronous>, transform_indices = @transform_8, window_bounds = array<i64: 3, 4, 1>}, {pipeline_mode = #tpu.pipeline_mode<synchronous>, transform_indices = @transform_9, window_bounds = array<i64: 3, 4, 1>}, {transform_indices = @transform_10, window_bounds = array<i64: 1, 4, 128>}]} {
    %c0 = arith.constant 0 : index
    %c0_0 = arith.constant 0 : index
    %c0_1 = arith.constant 0 : index
    %0 = vector.load %arg1[%c0, %c0_0, %c0_1] : memref<1x4x128xf32, #tpu.memory_space<vmem>>, vector<1x4x128xf32>
    %1 = vector.shape_cast %0 : vector<1x4x128xf32> to vector<4x128xf32>
    %c0_2 = arith.constant 0 : index
    %c0_3 = arith.constant 0 : index
    %c0_4 = arith.constant 0 : index
    %2 = vector.load %arg2[%c0_2, %c0_3, %c0_4] : memref<1x1x128xf32, #tpu.memory_space<vmem>>, vector<1x1x128xf32>
    %3 = vector.shape_cast %2 : vector<1x1x128xf32> to vector<1x128xf32>
    %4 = vector.broadcast %3 : vector<1x128xf32> to vector<4x128xf32>
    %5 = arith.mulf %1, %4 : vector<4x128xf32>
    %c0_5 = arith.constant 0 : index
    %c0_6 = arith.constant 0 : index
    %c0_7 = arith.constant 0 : index
    %6 = vector.load %arg3[%c0_5, %c0_6, %c0_7] : memref<3x4x3xf32, #tpu.memory_space<vmem>>, vector<1x4x3xf32>
    %7 = vector.shape_cast %6 : vector<1x4x3xf32> to vector<4x3xf32>
    %cst = arith.constant 0.000000e+00 : f32
    %8 = vector.broadcast %cst : f32 to vector<4x128xf32>
    %c1_i32 = arith.constant 1 : i32
    %9 = tpu.dynamic_rotate %5 by %c1_i32 dim 1 : vector<4x128xf32>, i32 -> vector<4x128xf32>
    %10 = vector.extract_strided_slice %7 {offsets = [0, 0], sizes = [4, 1], strides = [1, 1]} : vector<4x3xf32> to vector<4x1xf32>
    %11 = vector.broadcast %10 : vector<4x1xf32> to vector<4x128xf32>
    %12 = arith.mulf %11, %9 : vector<4x128xf32>
    %13 = arith.addf %8, %12 : vector<4x128xf32>
    %14 = vector.extract_strided_slice %7 {offsets = [0, 1], sizes = [4, 1], strides = [1, 1]} : vector<4x3xf32> to vector<4x1xf32>
    %15 = vector.broadcast %14 : vector<4x1xf32> to vector<4x128xf32>
    %16 = arith.mulf %15, %5 : vector<4x128xf32>
    %17 = arith.addf %13, %16 : vector<4x128xf32>
    %c127_i32 = arith.constant 127 : i32
    %18 = tpu.dynamic_rotate %5 by %c127_i32 dim 1 : vector<4x128xf32>, i32 -> vector<4x128xf32>
    %19 = vector.extract_strided_slice %7 {offsets = [0, 2], sizes = [4, 1], strides = [1, 1]} : vector<4x3xf32> to vector<4x1xf32>
    %20 = vector.broadcast %19 : vector<4x1xf32> to vector<4x128xf32>
    %21 = arith.mulf %20, %18 : vector<4x128xf32>
    %22 = arith.addf %17, %21 : vector<4x128xf32>
    %c0_8 = arith.constant 0 : index
    %c0_9 = arith.constant 0 : index
    %c0_10 = arith.constant 0 : index
    %23 = vector.load %arg4[%c0_8, %c0_9, %c0_10] : memref<3x4x1xf32, #tpu.memory_space<vmem>>, vector<1x4x1xf32>
    %24 = vector.shape_cast %23 : vector<1x4x1xf32> to vector<4x1xf32>
    %25 = vector.broadcast %24 : vector<4x1xf32> to vector<4x128xf32>
    %26 = arith.addf %22, %25 : vector<4x128xf32>
    %c0_11 = arith.constant 0 : index
    %c0_12 = arith.constant 0 : index
    %c0_13 = arith.constant 0 : index
    %27 = vector.load %arg7[%c0_11, %c0_12, %c0_13] : memref<3x4x1xf32, #tpu.memory_space<vmem>>, vector<1x4x1xf32>
    %28 = vector.shape_cast %27 : vector<1x4x1xf32> to vector<4x1xf32>
    %c0_14 = arith.constant 0 : index
    %c0_15 = arith.constant 0 : index
    %c0_16 = arith.constant 0 : index
    %29 = vector.load %arg8[%c0_14, %c0_15, %c0_16] : memref<3x4x1xf32, #tpu.memory_space<vmem>>, vector<1x4x1xf32>
    %30 = vector.shape_cast %29 : vector<1x4x1xf32> to vector<4x1xf32>
    %cst_17 = arith.constant dense<0.000000e+00> : vector<128xf32>
    %31 = vector.multi_reduction <add>, %26, %cst_17 [0] : vector<4x128xf32> to vector<128xf32>
    %32 = vector.shape_cast %31 : vector<128xf32> to vector<1x128xf32>
    %cst_18 = arith.constant 4.000000e+00 : f32
    %33 = vector.broadcast %cst_18 : f32 to vector<1x128xf32>
    %34 = arith.divf %32, %33 : vector<1x128xf32>
    %35 = vector.broadcast %34 : vector<1x128xf32> to vector<4x128xf32>
    %36 = arith.subf %26, %35 : vector<4x128xf32>
    %37 = arith.mulf %36, %36 : vector<4x128xf32>
    %cst_19 = arith.constant dense<0.000000e+00> : vector<128xf32>
    %38 = vector.multi_reduction <add>, %37, %cst_19 [0] : vector<4x128xf32> to vector<128xf32>
    %39 = vector.shape_cast %38 : vector<128xf32> to vector<1x128xf32>
    %cst_20 = arith.constant 4.000000e+00 : f32
    %40 = vector.broadcast %cst_20 : f32 to vector<1x128xf32>
    %41 = arith.divf %39, %40 : vector<1x128xf32>
    %42 = vector.broadcast %34 : vector<1x128xf32> to vector<4x128xf32>
    %43 = arith.subf %26, %42 : vector<4x128xf32>
    %cst_21 = arith.constant 9.99999974E-6 : f32
    %44 = vector.broadcast %cst_21 : f32 to vector<1x128xf32>
    %45 = arith.addf %41, %44 : vector<1x128xf32>
    %46 = math.rsqrt %45 : vector<1x128xf32>
    %47 = vector.broadcast %46 : vector<1x128xf32> to vector<4x128xf32>
    %48 = arith.mulf %43, %47 : vector<4x128xf32>
    %49 = vector.broadcast %28 : vector<4x1xf32> to vector<4x128xf32>
    %50 = arith.mulf %48, %49 : vector<4x128xf32>
    %51 = vector.broadcast %30 : vector<4x1xf32> to vector<4x128xf32>
    %52 = arith.addf %50, %51 : vector<4x128xf32>
    %cst_22 = arith.constant 5.000000e-01 : f32
    %53 = vector.broadcast %cst_22 : f32 to vector<4x128xf32>
    %54 = arith.mulf %53, %52 : vector<4x128xf32>
    %cst_23 = arith.constant 0.707106769 : f32
    %55 = vector.broadcast %cst_23 : f32 to vector<4x128xf32>
    %56 = arith.mulf %52, %55 : vector<4x128xf32>
    %57 = math.absf %56 : vector<4x128xf32>
    %cst_24 = arith.constant 0.327591091 : f32
    %58 = vector.broadcast %cst_24 : f32 to vector<4x128xf32>
    %59 = arith.mulf %58, %57 : vector<4x128xf32>
    %cst_25 = arith.constant 1.000000e+00 : f32
    %60 = vector.broadcast %cst_25 : f32 to vector<4x128xf32>
    %61 = arith.addf %60, %59 : vector<4x128xf32>
    %cst_26 = arith.constant 1.000000e+00 : f32
    %62 = vector.broadcast %cst_26 : f32 to vector<4x128xf32>
    %63 = arith.divf %62, %61 : vector<4x128xf32>
    %cst_27 = arith.constant 1.06140542 : f32
    %64 = vector.broadcast %cst_27 : f32 to vector<4x128xf32>
    %65 = arith.mulf %63, %64 : vector<4x128xf32>
    %cst_28 = arith.constant -1.45315206 : f32
    %66 = vector.broadcast %cst_28 : f32 to vector<4x128xf32>
    %67 = arith.addf %66, %65 : vector<4x128xf32>
    %68 = arith.mulf %63, %67 : vector<4x128xf32>
    %cst_29 = arith.constant 1.42141378 : f32
    %69 = vector.broadcast %cst_29 : f32 to vector<4x128xf32>
    %70 = arith.addf %69, %68 : vector<4x128xf32>
    %71 = arith.mulf %63, %70 : vector<4x128xf32>
    %cst_30 = arith.constant -0.284496725 : f32
    %72 = vector.broadcast %cst_30 : f32 to vector<4x128xf32>
    %73 = arith.addf %72, %71 : vector<4x128xf32>
    %74 = arith.mulf %63, %73 : vector<4x128xf32>
    %cst_31 = arith.constant 0.254829586 : f32
    %75 = vector.broadcast %cst_31 : f32 to vector<4x128xf32>
    %76 = arith.addf %75, %74 : vector<4x128xf32>
    %77 = arith.mulf %63, %76 : vector<4x128xf32>
    %cst_32 = arith.constant 0.000000e+00 : f32
    %78 = vector.broadcast %cst_32 : f32 to vector<4x128xf32>
    %79 = arith.subf %78, %57 : vector<4x128xf32>
    %80 = arith.mulf %79, %57 : vector<4x128xf32>
    %81 = math.exp %80 : vector<4x128xf32>
    %82 = arith.mulf %77, %81 : vector<4x128xf32>
    %cst_33 = arith.constant 1.000000e+00 : f32
    %83 = vector.broadcast %cst_33 : f32 to vector<4x128xf32>
    %84 = arith.subf %83, %82 : vector<4x128xf32>
    %cst_34 = arith.constant 0.000000e+00 : f32
    %85 = vector.broadcast %cst_34 : f32 to vector<4x128xf32>
    %86 = arith.cmpf oge, %56, %85 : vector<4x128xf32>
    %cst_35 = arith.constant 0.000000e+00 : f32
    %87 = vector.broadcast %cst_35 : f32 to vector<4x128xf32>
    %88 = arith.subf %87, %84 : vector<4x128xf32>
    %89 = arith.select %86, %84, %88 : vector<4x128xi1>, vector<4x128xf32>
    %cst_36 = arith.constant 1.000000e+00 : f32
    %90 = vector.broadcast %cst_36 : f32 to vector<4x128xf32>
    %91 = arith.addf %90, %89 : vector<4x128xf32>
    %92 = arith.mulf %54, %91 : vector<4x128xf32>
    %c0_37 = arith.constant 0 : index
    %c0_38 = arith.constant 0 : index
    %c0_39 = arith.constant 0 : index
    %93 = vector.load %arg5[%c0_37, %c0_38, %c0_39] : memref<3x4x4xf32, #tpu.memory_space<vmem>>, vector<1x4x4xf32>
    %94 = vector.shape_cast %93 : vector<1x4x4xf32> to vector<4x4xf32>
    %cst_40 = arith.constant dense<0.000000e+00> : vector<4x128xf32>
    %95 = tpu.matmul %94, %92, %cst_40 {dimension_numbers = #tpu.dot_dimension_numbers<[1], [0], [0], [1], [0, 0, 1, 1], [], []>} : vector<4x4xf32>, vector<4x128xf32>, vector<4x128xf32> -> vector<4x128xf32>
    %c0_41 = arith.constant 0 : index
    %c0_42 = arith.constant 0 : index
    %c0_43 = arith.constant 0 : index
    %96 = vector.load %arg6[%c0_41, %c0_42, %c0_43] : memref<3x4x1xf32, #tpu.memory_space<vmem>>, vector<1x4x1xf32>
    %97 = vector.shape_cast %96 : vector<1x4x1xf32> to vector<4x1xf32>
    %98 = vector.broadcast %97 : vector<4x1xf32> to vector<4x128xf32>
    %99 = arith.addf %95, %98 : vector<4x128xf32>
    %c0_44 = arith.constant 0 : index
    %c0_45 = arith.constant 0 : index
    %c0_46 = arith.constant 0 : index
    %100 = vector.load %arg9[%c0_44, %c0_45, %c0_46] : memref<3x4x1xf32, #tpu.memory_space<vmem>>, vector<1x4x1xf32>
    %101 = vector.shape_cast %100 : vector<1x4x1xf32> to vector<4x1xf32>
    %c0_47 = arith.constant 0 : index
    %c0_48 = arith.constant 0 : index
    %c0_49 = arith.constant 0 : index
    %102 = vector.load %arg10[%c0_47, %c0_48, %c0_49] : memref<3x4x1xf32, #tpu.memory_space<vmem>>, vector<1x4x1xf32>
    %103 = vector.shape_cast %102 : vector<1x4x1xf32> to vector<4x1xf32>
    %cst_50 = arith.constant dense<0.000000e+00> : vector<128xf32>
    %104 = vector.multi_reduction <add>, %99, %cst_50 [0] : vector<4x128xf32> to vector<128xf32>
    %105 = vector.shape_cast %104 : vector<128xf32> to vector<1x128xf32>
    %cst_51 = arith.constant 4.000000e+00 : f32
    %106 = vector.broadcast %cst_51 : f32 to vector<1x128xf32>
    %107 = arith.divf %105, %106 : vector<1x128xf32>
    %108 = vector.broadcast %107 : vector<1x128xf32> to vector<4x128xf32>
    %109 = arith.subf %99, %108 : vector<4x128xf32>
    %110 = arith.mulf %109, %109 : vector<4x128xf32>
    %cst_52 = arith.constant dense<0.000000e+00> : vector<128xf32>
    %111 = vector.multi_reduction <add>, %110, %cst_52 [0] : vector<4x128xf32> to vector<128xf32>
    %112 = vector.shape_cast %111 : vector<128xf32> to vector<1x128xf32>
    %cst_53 = arith.constant 4.000000e+00 : f32
    %113 = vector.broadcast %cst_53 : f32 to vector<1x128xf32>
    %114 = arith.divf %112, %113 : vector<1x128xf32>
    %115 = vector.broadcast %107 : vector<1x128xf32> to vector<4x128xf32>
    %116 = arith.subf %99, %115 : vector<4x128xf32>
    %cst_54 = arith.constant 9.99999974E-6 : f32
    %117 = vector.broadcast %cst_54 : f32 to vector<1x128xf32>
    %118 = arith.addf %114, %117 : vector<1x128xf32>
    %119 = math.rsqrt %118 : vector<1x128xf32>
    %120 = vector.broadcast %119 : vector<1x128xf32> to vector<4x128xf32>
    %121 = arith.mulf %116, %120 : vector<4x128xf32>
    %122 = vector.broadcast %101 : vector<4x1xf32> to vector<4x128xf32>
    %123 = arith.mulf %121, %122 : vector<4x128xf32>
    %124 = vector.broadcast %103 : vector<4x1xf32> to vector<4x128xf32>
    %125 = arith.addf %123, %124 : vector<4x128xf32>
    %cst_55 = arith.constant 5.000000e-01 : f32
    %126 = vector.broadcast %cst_55 : f32 to vector<4x128xf32>
    %127 = arith.mulf %126, %125 : vector<4x128xf32>
    %cst_56 = arith.constant 0.707106769 : f32
    %128 = vector.broadcast %cst_56 : f32 to vector<4x128xf32>
    %129 = arith.mulf %125, %128 : vector<4x128xf32>
    %130 = math.absf %129 : vector<4x128xf32>
    %cst_57 = arith.constant 0.327591091 : f32
    %131 = vector.broadcast %cst_57 : f32 to vector<4x128xf32>
    %132 = arith.mulf %131, %130 : vector<4x128xf32>
    %cst_58 = arith.constant 1.000000e+00 : f32
    %133 = vector.broadcast %cst_58 : f32 to vector<4x128xf32>
    %134 = arith.addf %133, %132 : vector<4x128xf32>
    %cst_59 = arith.constant 1.000000e+00 : f32
    %135 = vector.broadcast %cst_59 : f32 to vector<4x128xf32>
    %136 = arith.divf %135, %134 : vector<4x128xf32>
    %cst_60 = arith.constant 1.06140542 : f32
    %137 = vector.broadcast %cst_60 : f32 to vector<4x128xf32>
    %138 = arith.mulf %136, %137 : vector<4x128xf32>
    %cst_61 = arith.constant -1.45315206 : f32
    %139 = vector.broadcast %cst_61 : f32 to vector<4x128xf32>
    %140 = arith.addf %139, %138 : vector<4x128xf32>
    %141 = arith.mulf %136, %140 : vector<4x128xf32>
    %cst_62 = arith.constant 1.42141378 : f32
    %142 = vector.broadcast %cst_62 : f32 to vector<4x128xf32>
    %143 = arith.addf %142, %141 : vector<4x128xf32>
    %144 = arith.mulf %136, %143 : vector<4x128xf32>
    %cst_63 = arith.constant -0.284496725 : f32
    %145 = vector.broadcast %cst_63 : f32 to vector<4x128xf32>
    %146 = arith.addf %145, %144 : vector<4x128xf32>
    %147 = arith.mulf %136, %146 : vector<4x128xf32>
    %cst_64 = arith.constant 0.254829586 : f32
    %148 = vector.broadcast %cst_64 : f32 to vector<4x128xf32>
    %149 = arith.addf %148, %147 : vector<4x128xf32>
    %150 = arith.mulf %136, %149 : vector<4x128xf32>
    %cst_65 = arith.constant 0.000000e+00 : f32
    %151 = vector.broadcast %cst_65 : f32 to vector<4x128xf32>
    %152 = arith.subf %151, %130 : vector<4x128xf32>
    %153 = arith.mulf %152, %130 : vector<4x128xf32>
    %154 = math.exp %153 : vector<4x128xf32>
    %155 = arith.mulf %150, %154 : vector<4x128xf32>
    %cst_66 = arith.constant 1.000000e+00 : f32
    %156 = vector.broadcast %cst_66 : f32 to vector<4x128xf32>
    %157 = arith.subf %156, %155 : vector<4x128xf32>
    %cst_67 = arith.constant 0.000000e+00 : f32
    %158 = vector.broadcast %cst_67 : f32 to vector<4x128xf32>
    %159 = arith.cmpf oge, %129, %158 : vector<4x128xf32>
    %cst_68 = arith.constant 0.000000e+00 : f32
    %160 = vector.broadcast %cst_68 : f32 to vector<4x128xf32>
    %161 = arith.subf %160, %157 : vector<4x128xf32>
    %162 = arith.select %159, %157, %161 : vector<4x128xi1>, vector<4x128xf32>
    %cst_69 = arith.constant 1.000000e+00 : f32
    %163 = vector.broadcast %cst_69 : f32 to vector<4x128xf32>
    %164 = arith.addf %163, %162 : vector<4x128xf32>
    %165 = arith.mulf %127, %164 : vector<4x128xf32>
    %166 = arith.addf %1, %165 : vector<4x128xf32>
    %167 = vector.broadcast %3 : vector<1x128xf32> to vector<4x128xf32>
    %168 = arith.mulf %166, %167 : vector<4x128xf32>
    %c1 = arith.constant 1 : index
    %c0_70 = arith.constant 0 : index
    %c0_71 = arith.constant 0 : index
    %169 = vector.load %arg3[%c1, %c0_70, %c0_71] : memref<3x4x3xf32, #tpu.memory_space<vmem>>, vector<1x4x3xf32>
    %170 = vector.shape_cast %169 : vector<1x4x3xf32> to vector<4x3xf32>
    %cst_72 = arith.constant 0.000000e+00 : f32
    %171 = vector.broadcast %cst_72 : f32 to vector<4x128xf32>
    %c3_i32 = arith.constant 3 : i32
    %172 = tpu.dynamic_rotate %168 by %c3_i32 dim 1 : vector<4x128xf32>, i32 -> vector<4x128xf32>
    %173 = vector.extract_strided_slice %170 {offsets = [0, 0], sizes = [4, 1], strides = [1, 1]} : vector<4x3xf32> to vector<4x1xf32>
    %174 = vector.broadcast %173 : vector<4x1xf32> to vector<4x128xf32>
    %175 = arith.mulf %174, %172 : vector<4x128xf32>
    %176 = arith.addf %171, %175 : vector<4x128xf32>
    %177 = vector.extract_strided_slice %170 {offsets = [0, 1], sizes = [4, 1], strides = [1, 1]} : vector<4x3xf32> to vector<4x1xf32>
    %178 = vector.broadcast %177 : vector<4x1xf32> to vector<4x128xf32>
    %179 = arith.mulf %178, %168 : vector<4x128xf32>
    %180 = arith.addf %176, %179 : vector<4x128xf32>
    %c125_i32 = arith.constant 125 : i32
    %181 = tpu.dynamic_rotate %168 by %c125_i32 dim 1 : vector<4x128xf32>, i32 -> vector<4x128xf32>
    %182 = vector.extract_strided_slice %170 {offsets = [0, 2], sizes = [4, 1], strides = [1, 1]} : vector<4x3xf32> to vector<4x1xf32>
    %183 = vector.broadcast %182 : vector<4x1xf32> to vector<4x128xf32>
    %184 = arith.mulf %183, %181 : vector<4x128xf32>
    %185 = arith.addf %180, %184 : vector<4x128xf32>
    %c1_73 = arith.constant 1 : index
    %c0_74 = arith.constant 0 : index
    %c0_75 = arith.constant 0 : index
    %186 = vector.load %arg4[%c1_73, %c0_74, %c0_75] : memref<3x4x1xf32, #tpu.memory_space<vmem>>, vector<1x4x1xf32>
    %187 = vector.shape_cast %186 : vector<1x4x1xf32> to vector<4x1xf32>
    %188 = vector.broadcast %187 : vector<4x1xf32> to vector<4x128xf32>
    %189 = arith.addf %185, %188 : vector<4x128xf32>
    %c1_76 = arith.constant 1 : index
    %c0_77 = arith.constant 0 : index
    %c0_78 = arith.constant 0 : index
    %190 = vector.load %arg7[%c1_76, %c0_77, %c0_78] : memref<3x4x1xf32, #tpu.memory_space<vmem>>, vector<1x4x1xf32>
    %191 = vector.shape_cast %190 : vector<1x4x1xf32> to vector<4x1xf32>
    %c1_79 = arith.constant 1 : index
    %c0_80 = arith.constant 0 : index
    %c0_81 = arith.constant 0 : index
    %192 = vector.load %arg8[%c1_79, %c0_80, %c0_81] : memref<3x4x1xf32, #tpu.memory_space<vmem>>, vector<1x4x1xf32>
    %193 = vector.shape_cast %192 : vector<1x4x1xf32> to vector<4x1xf32>
    %cst_82 = arith.constant dense<0.000000e+00> : vector<128xf32>
    %194 = vector.multi_reduction <add>, %189, %cst_82 [0] : vector<4x128xf32> to vector<128xf32>
    %195 = vector.shape_cast %194 : vector<128xf32> to vector<1x128xf32>
    %cst_83 = arith.constant 4.000000e+00 : f32
    %196 = vector.broadcast %cst_83 : f32 to vector<1x128xf32>
    %197 = arith.divf %195, %196 : vector<1x128xf32>
    %198 = vector.broadcast %197 : vector<1x128xf32> to vector<4x128xf32>
    %199 = arith.subf %189, %198 : vector<4x128xf32>
    %200 = arith.mulf %199, %199 : vector<4x128xf32>
    %cst_84 = arith.constant dense<0.000000e+00> : vector<128xf32>
    %201 = vector.multi_reduction <add>, %200, %cst_84 [0] : vector<4x128xf32> to vector<128xf32>
    %202 = vector.shape_cast %201 : vector<128xf32> to vector<1x128xf32>
    %cst_85 = arith.constant 4.000000e+00 : f32
    %203 = vector.broadcast %cst_85 : f32 to vector<1x128xf32>
    %204 = arith.divf %202, %203 : vector<1x128xf32>
    %205 = vector.broadcast %197 : vector<1x128xf32> to vector<4x128xf32>
    %206 = arith.subf %189, %205 : vector<4x128xf32>
    %cst_86 = arith.constant 9.99999974E-6 : f32
    %207 = vector.broadcast %cst_86 : f32 to vector<1x128xf32>
    %208 = arith.addf %204, %207 : vector<1x128xf32>
    %209 = math.rsqrt %208 : vector<1x128xf32>
    %210 = vector.broadcast %209 : vector<1x128xf32> to vector<4x128xf32>
    %211 = arith.mulf %206, %210 : vector<4x128xf32>
    %212 = vector.broadcast %191 : vector<4x1xf32> to vector<4x128xf32>
    %213 = arith.mulf %211, %212 : vector<4x128xf32>
    %214 = vector.broadcast %193 : vector<4x1xf32> to vector<4x128xf32>
    %215 = arith.addf %213, %214 : vector<4x128xf32>
    %cst_87 = arith.constant 5.000000e-01 : f32
    %216 = vector.broadcast %cst_87 : f32 to vector<4x128xf32>
    %217 = arith.mulf %216, %215 : vector<4x128xf32>
    %cst_88 = arith.constant 0.707106769 : f32
    %218 = vector.broadcast %cst_88 : f32 to vector<4x128xf32>
    %219 = arith.mulf %215, %218 : vector<4x128xf32>
    %220 = math.absf %219 : vector<4x128xf32>
    %cst_89 = arith.constant 0.327591091 : f32
    %221 = vector.broadcast %cst_89 : f32 to vector<4x128xf32>
    %222 = arith.mulf %221, %220 : vector<4x128xf32>
    %cst_90 = arith.constant 1.000000e+00 : f32
    %223 = vector.broadcast %cst_90 : f32 to vector<4x128xf32>
    %224 = arith.addf %223, %222 : vector<4x128xf32>
    %cst_91 = arith.constant 1.000000e+00 : f32
    %225 = vector.broadcast %cst_91 : f32 to vector<4x128xf32>
    %226 = arith.divf %225, %224 : vector<4x128xf32>
    %cst_92 = arith.constant 1.06140542 : f32
    %227 = vector.broadcast %cst_92 : f32 to vector<4x128xf32>
    %228 = arith.mulf %226, %227 : vector<4x128xf32>
    %cst_93 = arith.constant -1.45315206 : f32
    %229 = vector.broadcast %cst_93 : f32 to vector<4x128xf32>
    %230 = arith.addf %229, %228 : vector<4x128xf32>
    %231 = arith.mulf %226, %230 : vector<4x128xf32>
    %cst_94 = arith.constant 1.42141378 : f32
    %232 = vector.broadcast %cst_94 : f32 to vector<4x128xf32>
    %233 = arith.addf %232, %231 : vector<4x128xf32>
    %234 = arith.mulf %226, %233 : vector<4x128xf32>
    %cst_95 = arith.constant -0.284496725 : f32
    %235 = vector.broadcast %cst_95 : f32 to vector<4x128xf32>
    %236 = arith.addf %235, %234 : vector<4x128xf32>
    %237 = arith.mulf %226, %236 : vector<4x128xf32>
    %cst_96 = arith.constant 0.254829586 : f32
    %238 = vector.broadcast %cst_96 : f32 to vector<4x128xf32>
    %239 = arith.addf %238, %237 : vector<4x128xf32>
    %240 = arith.mulf %226, %239 : vector<4x128xf32>
    %cst_97 = arith.constant 0.000000e+00 : f32
    %241 = vector.broadcast %cst_97 : f32 to vector<4x128xf32>
    %242 = arith.subf %241, %220 : vector<4x128xf32>
    %243 = arith.mulf %242, %220 : vector<4x128xf32>
    %244 = math.exp %243 : vector<4x128xf32>
    %245 = arith.mulf %240, %244 : vector<4x128xf32>
    %cst_98 = arith.constant 1.000000e+00 : f32
    %246 = vector.broadcast %cst_98 : f32 to vector<4x128xf32>
    %247 = arith.subf %246, %245 : vector<4x128xf32>
    %cst_99 = arith.constant 0.000000e+00 : f32
    %248 = vector.broadcast %cst_99 : f32 to vector<4x128xf32>
    %249 = arith.cmpf oge, %219, %248 : vector<4x128xf32>
    %cst_100 = arith.constant 0.000000e+00 : f32
    %250 = vector.broadcast %cst_100 : f32 to vector<4x128xf32>
    %251 = arith.subf %250, %247 : vector<4x128xf32>
    %252 = arith.select %249, %247, %251 : vector<4x128xi1>, vector<4x128xf32>
    %cst_101 = arith.constant 1.000000e+00 : f32
    %253 = vector.broadcast %cst_101 : f32 to vector<4x128xf32>
    %254 = arith.addf %253, %252 : vector<4x128xf32>
    %255 = arith.mulf %217, %254 : vector<4x128xf32>
    %c1_102 = arith.constant 1 : index
    %c0_103 = arith.constant 0 : index
    %c0_104 = arith.constant 0 : index
    %256 = vector.load %arg5[%c1_102, %c0_103, %c0_104] : memref<3x4x4xf32, #tpu.memory_space<vmem>>, vector<1x4x4xf32>
    %257 = vector.shape_cast %256 : vector<1x4x4xf32> to vector<4x4xf32>
    %cst_105 = arith.constant dense<0.000000e+00> : vector<4x128xf32>
    %258 = tpu.matmul %257, %255, %cst_105 {dimension_numbers = #tpu.dot_dimension_numbers<[1], [0], [0], [1], [0, 0, 1, 1], [], []>} : vector<4x4xf32>, vector<4x128xf32>, vector<4x128xf32> -> vector<4x128xf32>
    %c1_106 = arith.constant 1 : index
    %c0_107 = arith.constant 0 : index
    %c0_108 = arith.constant 0 : index
    %259 = vector.load %arg6[%c1_106, %c0_107, %c0_108] : memref<3x4x1xf32, #tpu.memory_space<vmem>>, vector<1x4x1xf32>
    %260 = vector.shape_cast %259 : vector<1x4x1xf32> to vector<4x1xf32>
    %261 = vector.broadcast %260 : vector<4x1xf32> to vector<4x128xf32>
    %262 = arith.addf %258, %261 : vector<4x128xf32>
    %c1_109 = arith.constant 1 : index
    %c0_110 = arith.constant 0 : index
    %c0_111 = arith.constant 0 : index
    %263 = vector.load %arg9[%c1_109, %c0_110, %c0_111] : memref<3x4x1xf32, #tpu.memory_space<vmem>>, vector<1x4x1xf32>
    %264 = vector.shape_cast %263 : vector<1x4x1xf32> to vector<4x1xf32>
    %c1_112 = arith.constant 1 : index
    %c0_113 = arith.constant 0 : index
    %c0_114 = arith.constant 0 : index
    %265 = vector.load %arg10[%c1_112, %c0_113, %c0_114] : memref<3x4x1xf32, #tpu.memory_space<vmem>>, vector<1x4x1xf32>
    %266 = vector.shape_cast %265 : vector<1x4x1xf32> to vector<4x1xf32>
    %cst_115 = arith.constant dense<0.000000e+00> : vector<128xf32>
    %267 = vector.multi_reduction <add>, %262, %cst_115 [0] : vector<4x128xf32> to vector<128xf32>
    %268 = vector.shape_cast %267 : vector<128xf32> to vector<1x128xf32>
    %cst_116 = arith.constant 4.000000e+00 : f32
    %269 = vector.broadcast %cst_116 : f32 to vector<1x128xf32>
    %270 = arith.divf %268, %269 : vector<1x128xf32>
    %271 = vector.broadcast %270 : vector<1x128xf32> to vector<4x128xf32>
    %272 = arith.subf %262, %271 : vector<4x128xf32>
    %273 = arith.mulf %272, %272 : vector<4x128xf32>
    %cst_117 = arith.constant dense<0.000000e+00> : vector<128xf32>
    %274 = vector.multi_reduction <add>, %273, %cst_117 [0] : vector<4x128xf32> to vector<128xf32>
    %275 = vector.shape_cast %274 : vector<128xf32> to vector<1x128xf32>
    %cst_118 = arith.constant 4.000000e+00 : f32
    %276 = vector.broadcast %cst_118 : f32 to vector<1x128xf32>
    %277 = arith.divf %275, %276 : vector<1x128xf32>
    %278 = vector.broadcast %270 : vector<1x128xf32> to vector<4x128xf32>
    %279 = arith.subf %262, %278 : vector<4x128xf32>
    %cst_119 = arith.constant 9.99999974E-6 : f32
    %280 = vector.broadcast %cst_119 : f32 to vector<1x128xf32>
    %281 = arith.addf %277, %280 : vector<1x128xf32>
    %282 = math.rsqrt %281 : vector<1x128xf32>
    %283 = vector.broadcast %282 : vector<1x128xf32> to vector<4x128xf32>
    %284 = arith.mulf %279, %283 : vector<4x128xf32>
    %285 = vector.broadcast %264 : vector<4x1xf32> to vector<4x128xf32>
    %286 = arith.mulf %284, %285 : vector<4x128xf32>
    %287 = vector.broadcast %266 : vector<4x1xf32> to vector<4x128xf32>
    %288 = arith.addf %286, %287 : vector<4x128xf32>
    %cst_120 = arith.constant 5.000000e-01 : f32
    %289 = vector.broadcast %cst_120 : f32 to vector<4x128xf32>
    %290 = arith.mulf %289, %288 : vector<4x128xf32>
    %cst_121 = arith.constant 0.707106769 : f32
    %291 = vector.broadcast %cst_121 : f32 to vector<4x128xf32>
    %292 = arith.mulf %288, %291 : vector<4x128xf32>
    %293 = math.absf %292 : vector<4x128xf32>
    %cst_122 = arith.constant 0.327591091 : f32
    %294 = vector.broadcast %cst_122 : f32 to vector<4x128xf32>
    %295 = arith.mulf %294, %293 : vector<4x128xf32>
    %cst_123 = arith.constant 1.000000e+00 : f32
    %296 = vector.broadcast %cst_123 : f32 to vector<4x128xf32>
    %297 = arith.addf %296, %295 : vector<4x128xf32>
    %cst_124 = arith.constant 1.000000e+00 : f32
    %298 = vector.broadcast %cst_124 : f32 to vector<4x128xf32>
    %299 = arith.divf %298, %297 : vector<4x128xf32>
    %cst_125 = arith.constant 1.06140542 : f32
    %300 = vector.broadcast %cst_125 : f32 to vector<4x128xf32>
    %301 = arith.mulf %299, %300 : vector<4x128xf32>
    %cst_126 = arith.constant -1.45315206 : f32
    %302 = vector.broadcast %cst_126 : f32 to vector<4x128xf32>
    %303 = arith.addf %302, %301 : vector<4x128xf32>
    %304 = arith.mulf %299, %303 : vector<4x128xf32>
    %cst_127 = arith.constant 1.42141378 : f32
    %305 = vector.broadcast %cst_127 : f32 to vector<4x128xf32>
    %306 = arith.addf %305, %304 : vector<4x128xf32>
    %307 = arith.mulf %299, %306 : vector<4x128xf32>
    %cst_128 = arith.constant -0.284496725 : f32
    %308 = vector.broadcast %cst_128 : f32 to vector<4x128xf32>
    %309 = arith.addf %308, %307 : vector<4x128xf32>
    %310 = arith.mulf %299, %309 : vector<4x128xf32>
    %cst_129 = arith.constant 0.254829586 : f32
    %311 = vector.broadcast %cst_129 : f32 to vector<4x128xf32>
    %312 = arith.addf %311, %310 : vector<4x128xf32>
    %313 = arith.mulf %299, %312 : vector<4x128xf32>
    %cst_130 = arith.constant 0.000000e+00 : f32
    %314 = vector.broadcast %cst_130 : f32 to vector<4x128xf32>
    %315 = arith.subf %314, %293 : vector<4x128xf32>
    %316 = arith.mulf %315, %293 : vector<4x128xf32>
    %317 = math.exp %316 : vector<4x128xf32>
    %318 = arith.mulf %313, %317 : vector<4x128xf32>
    %cst_131 = arith.constant 1.000000e+00 : f32
    %319 = vector.broadcast %cst_131 : f32 to vector<4x128xf32>
    %320 = arith.subf %319, %318 : vector<4x128xf32>
    %cst_132 = arith.constant 0.000000e+00 : f32
    %321 = vector.broadcast %cst_132 : f32 to vector<4x128xf32>
    %322 = arith.cmpf oge, %292, %321 : vector<4x128xf32>
    %cst_133 = arith.constant 0.000000e+00 : f32
    %323 = vector.broadcast %cst_133 : f32 to vector<4x128xf32>
    %324 = arith.subf %323, %320 : vector<4x128xf32>
    %325 = arith.select %322, %320, %324 : vector<4x128xi1>, vector<4x128xf32>
    %cst_134 = arith.constant 1.000000e+00 : f32
    %326 = vector.broadcast %cst_134 : f32 to vector<4x128xf32>
    %327 = arith.addf %326, %325 : vector<4x128xf32>
    %328 = arith.mulf %290, %327 : vector<4x128xf32>
    %329 = arith.addf %166, %328 : vector<4x128xf32>
    %330 = vector.broadcast %3 : vector<1x128xf32> to vector<4x128xf32>
    %331 = arith.mulf %329, %330 : vector<4x128xf32>
    %c2 = arith.constant 2 : index
    %c0_135 = arith.constant 0 : index
    %c0_136 = arith.constant 0 : index
    %332 = vector.load %arg3[%c2, %c0_135, %c0_136] : memref<3x4x3xf32, #tpu.memory_space<vmem>>, vector<1x4x3xf32>
    %333 = vector.shape_cast %332 : vector<1x4x3xf32> to vector<4x3xf32>
    %cst_137 = arith.constant 0.000000e+00 : f32
    %334 = vector.broadcast %cst_137 : f32 to vector<4x128xf32>
    %c9_i32 = arith.constant 9 : i32
    %335 = tpu.dynamic_rotate %331 by %c9_i32 dim 1 : vector<4x128xf32>, i32 -> vector<4x128xf32>
    %336 = vector.extract_strided_slice %333 {offsets = [0, 0], sizes = [4, 1], strides = [1, 1]} : vector<4x3xf32> to vector<4x1xf32>
    %337 = vector.broadcast %336 : vector<4x1xf32> to vector<4x128xf32>
    %338 = arith.mulf %337, %335 : vector<4x128xf32>
    %339 = arith.addf %334, %338 : vector<4x128xf32>
    %340 = vector.extract_strided_slice %333 {offsets = [0, 1], sizes = [4, 1], strides = [1, 1]} : vector<4x3xf32> to vector<4x1xf32>
    %341 = vector.broadcast %340 : vector<4x1xf32> to vector<4x128xf32>
    %342 = arith.mulf %341, %331 : vector<4x128xf32>
    %343 = arith.addf %339, %342 : vector<4x128xf32>
    %c119_i32 = arith.constant 119 : i32
    %344 = tpu.dynamic_rotate %331 by %c119_i32 dim 1 : vector<4x128xf32>, i32 -> vector<4x128xf32>
    %345 = vector.extract_strided_slice %333 {offsets = [0, 2], sizes = [4, 1], strides = [1, 1]} : vector<4x3xf32> to vector<4x1xf32>
    %346 = vector.broadcast %345 : vector<4x1xf32> to vector<4x128xf32>
    %347 = arith.mulf %346, %344 : vector<4x128xf32>
    %348 = arith.addf %343, %347 : vector<4x128xf32>
    %c2_138 = arith.constant 2 : index
    %c0_139 = arith.constant 0 : index
    %c0_140 = arith.constant 0 : index
    %349 = vector.load %arg4[%c2_138, %c0_139, %c0_140] : memref<3x4x1xf32, #tpu.memory_space<vmem>>, vector<1x4x1xf32>
    %350 = vector.shape_cast %349 : vector<1x4x1xf32> to vector<4x1xf32>
    %351 = vector.broadcast %350 : vector<4x1xf32> to vector<4x128xf32>
    %352 = arith.addf %348, %351 : vector<4x128xf32>
    %c2_141 = arith.constant 2 : index
    %c0_142 = arith.constant 0 : index
    %c0_143 = arith.constant 0 : index
    %353 = vector.load %arg7[%c2_141, %c0_142, %c0_143] : memref<3x4x1xf32, #tpu.memory_space<vmem>>, vector<1x4x1xf32>
    %354 = vector.shape_cast %353 : vector<1x4x1xf32> to vector<4x1xf32>
    %c2_144 = arith.constant 2 : index
    %c0_145 = arith.constant 0 : index
    %c0_146 = arith.constant 0 : index
    %355 = vector.load %arg8[%c2_144, %c0_145, %c0_146] : memref<3x4x1xf32, #tpu.memory_space<vmem>>, vector<1x4x1xf32>
    %356 = vector.shape_cast %355 : vector<1x4x1xf32> to vector<4x1xf32>
    %cst_147 = arith.constant dense<0.000000e+00> : vector<128xf32>
    %357 = vector.multi_reduction <add>, %352, %cst_147 [0] : vector<4x128xf32> to vector<128xf32>
    %358 = vector.shape_cast %357 : vector<128xf32> to vector<1x128xf32>
    %cst_148 = arith.constant 4.000000e+00 : f32
    %359 = vector.broadcast %cst_148 : f32 to vector<1x128xf32>
    %360 = arith.divf %358, %359 : vector<1x128xf32>
    %361 = vector.broadcast %360 : vector<1x128xf32> to vector<4x128xf32>
    %362 = arith.subf %352, %361 : vector<4x128xf32>
    %363 = arith.mulf %362, %362 : vector<4x128xf32>
    %cst_149 = arith.constant dense<0.000000e+00> : vector<128xf32>
    %364 = vector.multi_reduction <add>, %363, %cst_149 [0] : vector<4x128xf32> to vector<128xf32>
    %365 = vector.shape_cast %364 : vector<128xf32> to vector<1x128xf32>
    %cst_150 = arith.constant 4.000000e+00 : f32
    %366 = vector.broadcast %cst_150 : f32 to vector<1x128xf32>
    %367 = arith.divf %365, %366 : vector<1x128xf32>
    %368 = vector.broadcast %360 : vector<1x128xf32> to vector<4x128xf32>
    %369 = arith.subf %352, %368 : vector<4x128xf32>
    %cst_151 = arith.constant 9.99999974E-6 : f32
    %370 = vector.broadcast %cst_151 : f32 to vector<1x128xf32>
    %371 = arith.addf %367, %370 : vector<1x128xf32>
    %372 = math.rsqrt %371 : vector<1x128xf32>
    %373 = vector.broadcast %372 : vector<1x128xf32> to vector<4x128xf32>
    %374 = arith.mulf %369, %373 : vector<4x128xf32>
    %375 = vector.broadcast %354 : vector<4x1xf32> to vector<4x128xf32>
    %376 = arith.mulf %374, %375 : vector<4x128xf32>
    %377 = vector.broadcast %356 : vector<4x1xf32> to vector<4x128xf32>
    %378 = arith.addf %376, %377 : vector<4x128xf32>
    %cst_152 = arith.constant 5.000000e-01 : f32
    %379 = vector.broadcast %cst_152 : f32 to vector<4x128xf32>
    %380 = arith.mulf %379, %378 : vector<4x128xf32>
    %cst_153 = arith.constant 0.707106769 : f32
    %381 = vector.broadcast %cst_153 : f32 to vector<4x128xf32>
    %382 = arith.mulf %378, %381 : vector<4x128xf32>
    %383 = math.absf %382 : vector<4x128xf32>
    %cst_154 = arith.constant 0.327591091 : f32
    %384 = vector.broadcast %cst_154 : f32 to vector<4x128xf32>
    %385 = arith.mulf %384, %383 : vector<4x128xf32>
    %cst_155 = arith.constant 1.000000e+00 : f32
    %386 = vector.broadcast %cst_155 : f32 to vector<4x128xf32>
    %387 = arith.addf %386, %385 : vector<4x128xf32>
    %cst_156 = arith.constant 1.000000e+00 : f32
    %388 = vector.broadcast %cst_156 : f32 to vector<4x128xf32>
    %389 = arith.divf %388, %387 : vector<4x128xf32>
    %cst_157 = arith.constant 1.06140542 : f32
    %390 = vector.broadcast %cst_157 : f32 to vector<4x128xf32>
    %391 = arith.mulf %389, %390 : vector<4x128xf32>
    %cst_158 = arith.constant -1.45315206 : f32
    %392 = vector.broadcast %cst_158 : f32 to vector<4x128xf32>
    %393 = arith.addf %392, %391 : vector<4x128xf32>
    %394 = arith.mulf %389, %393 : vector<4x128xf32>
    %cst_159 = arith.constant 1.42141378 : f32
    %395 = vector.broadcast %cst_159 : f32 to vector<4x128xf32>
    %396 = arith.addf %395, %394 : vector<4x128xf32>
    %397 = arith.mulf %389, %396 : vector<4x128xf32>
    %cst_160 = arith.constant -0.284496725 : f32
    %398 = vector.broadcast %cst_160 : f32 to vector<4x128xf32>
    %399 = arith.addf %398, %397 : vector<4x128xf32>
    %400 = arith.mulf %389, %399 : vector<4x128xf32>
    %cst_161 = arith.constant 0.254829586 : f32
    %401 = vector.broadcast %cst_161 : f32 to vector<4x128xf32>
    %402 = arith.addf %401, %400 : vector<4x128xf32>
    %403 = arith.mulf %389, %402 : vector<4x128xf32>
    %cst_162 = arith.constant 0.000000e+00 : f32
    %404 = vector.broadcast %cst_162 : f32 to vector<4x128xf32>
    %405 = arith.subf %404, %383 : vector<4x128xf32>
    %406 = arith.mulf %405, %383 : vector<4x128xf32>
    %407 = math.exp %406 : vector<4x128xf32>
    %408 = arith.mulf %403, %407 : vector<4x128xf32>
    %cst_163 = arith.constant 1.000000e+00 : f32
    %409 = vector.broadcast %cst_163 : f32 to vector<4x128xf32>
    %410 = arith.subf %409, %408 : vector<4x128xf32>
    %cst_164 = arith.constant 0.000000e+00 : f32
    %411 = vector.broadcast %cst_164 : f32 to vector<4x128xf32>
    %412 = arith.cmpf oge, %382, %411 : vector<4x128xf32>
    %cst_165 = arith.constant 0.000000e+00 : f32
    %413 = vector.broadcast %cst_165 : f32 to vector<4x128xf32>
    %414 = arith.subf %413, %410 : vector<4x128xf32>
    %415 = arith.select %412, %410, %414 : vector<4x128xi1>, vector<4x128xf32>
    %cst_166 = arith.constant 1.000000e+00 : f32
    %416 = vector.broadcast %cst_166 : f32 to vector<4x128xf32>
    %417 = arith.addf %416, %415 : vector<4x128xf32>
    %418 = arith.mulf %380, %417 : vector<4x128xf32>
    %c2_167 = arith.constant 2 : index
    %c0_168 = arith.constant 0 : index
    %c0_169 = arith.constant 0 : index
    %419 = vector.load %arg5[%c2_167, %c0_168, %c0_169] : memref<3x4x4xf32, #tpu.memory_space<vmem>>, vector<1x4x4xf32>
    %420 = vector.shape_cast %419 : vector<1x4x4xf32> to vector<4x4xf32>
    %cst_170 = arith.constant dense<0.000000e+00> : vector<4x128xf32>
    %421 = tpu.matmul %420, %418, %cst_170 {dimension_numbers = #tpu.dot_dimension_numbers<[1], [0], [0], [1], [0, 0, 1, 1], [], []>} : vector<4x4xf32>, vector<4x128xf32>, vector<4x128xf32> -> vector<4x128xf32>
    %c2_171 = arith.constant 2 : index
    %c0_172 = arith.constant 0 : index
    %c0_173 = arith.constant 0 : index
    %422 = vector.load %arg6[%c2_171, %c0_172, %c0_173] : memref<3x4x1xf32, #tpu.memory_space<vmem>>, vector<1x4x1xf32>
    %423 = vector.shape_cast %422 : vector<1x4x1xf32> to vector<4x1xf32>
    %424 = vector.broadcast %423 : vector<4x1xf32> to vector<4x128xf32>
    %425 = arith.addf %421, %424 : vector<4x128xf32>
    %c2_174 = arith.constant 2 : index
    %c0_175 = arith.constant 0 : index
    %c0_176 = arith.constant 0 : index
    %426 = vector.load %arg9[%c2_174, %c0_175, %c0_176] : memref<3x4x1xf32, #tpu.memory_space<vmem>>, vector<1x4x1xf32>
    %427 = vector.shape_cast %426 : vector<1x4x1xf32> to vector<4x1xf32>
    %c2_177 = arith.constant 2 : index
    %c0_178 = arith.constant 0 : index
    %c0_179 = arith.constant 0 : index
    %428 = vector.load %arg10[%c2_177, %c0_178, %c0_179] : memref<3x4x1xf32, #tpu.memory_space<vmem>>, vector<1x4x1xf32>
    %429 = vector.shape_cast %428 : vector<1x4x1xf32> to vector<4x1xf32>
    %cst_180 = arith.constant dense<0.000000e+00> : vector<128xf32>
    %430 = vector.multi_reduction <add>, %425, %cst_180 [0] : vector<4x128xf32> to vector<128xf32>
    %431 = vector.shape_cast %430 : vector<128xf32> to vector<1x128xf32>
    %cst_181 = arith.constant 4.000000e+00 : f32
    %432 = vector.broadcast %cst_181 : f32 to vector<1x128xf32>
    %433 = arith.divf %431, %432 : vector<1x128xf32>
    %434 = vector.broadcast %433 : vector<1x128xf32> to vector<4x128xf32>
    %435 = arith.subf %425, %434 : vector<4x128xf32>
    %436 = arith.mulf %435, %435 : vector<4x128xf32>
    %cst_182 = arith.constant dense<0.000000e+00> : vector<128xf32>
    %437 = vector.multi_reduction <add>, %436, %cst_182 [0] : vector<4x128xf32> to vector<128xf32>
    %438 = vector.shape_cast %437 : vector<128xf32> to vector<1x128xf32>
    %cst_183 = arith.constant 4.000000e+00 : f32
    %439 = vector.broadcast %cst_183 : f32 to vector<1x128xf32>
    %440 = arith.divf %438, %439 : vector<1x128xf32>
    %441 = vector.broadcast %433 : vector<1x128xf32> to vector<4x128xf32>
    %442 = arith.subf %425, %441 : vector<4x128xf32>
    %cst_184 = arith.constant 9.99999974E-6 : f32
    %443 = vector.broadcast %cst_184 : f32 to vector<1x128xf32>
    %444 = arith.addf %440, %443 : vector<1x128xf32>
    %445 = math.rsqrt %444 : vector<1x128xf32>
    %446 = vector.broadcast %445 : vector<1x128xf32> to vector<4x128xf32>
    %447 = arith.mulf %442, %446 : vector<4x128xf32>
    %448 = vector.broadcast %427 : vector<4x1xf32> to vector<4x128xf32>
    %449 = arith.mulf %447, %448 : vector<4x128xf32>
    %450 = vector.broadcast %429 : vector<4x1xf32> to vector<4x128xf32>
    %451 = arith.addf %449, %450 : vector<4x128xf32>
    %cst_185 = arith.constant 5.000000e-01 : f32
    %452 = vector.broadcast %cst_185 : f32 to vector<4x128xf32>
    %453 = arith.mulf %452, %451 : vector<4x128xf32>
    %cst_186 = arith.constant 0.707106769 : f32
    %454 = vector.broadcast %cst_186 : f32 to vector<4x128xf32>
    %455 = arith.mulf %451, %454 : vector<4x128xf32>
    %456 = math.absf %455 : vector<4x128xf32>
    %cst_187 = arith.constant 0.327591091 : f32
    %457 = vector.broadcast %cst_187 : f32 to vector<4x128xf32>
    %458 = arith.mulf %457, %456 : vector<4x128xf32>
    %cst_188 = arith.constant 1.000000e+00 : f32
    %459 = vector.broadcast %cst_188 : f32 to vector<4x128xf32>
    %460 = arith.addf %459, %458 : vector<4x128xf32>
    %cst_189 = arith.constant 1.000000e+00 : f32
    %461 = vector.broadcast %cst_189 : f32 to vector<4x128xf32>
    %462 = arith.divf %461, %460 : vector<4x128xf32>
    %cst_190 = arith.constant 1.06140542 : f32
    %463 = vector.broadcast %cst_190 : f32 to vector<4x128xf32>
    %464 = arith.mulf %462, %463 : vector<4x128xf32>
    %cst_191 = arith.constant -1.45315206 : f32
    %465 = vector.broadcast %cst_191 : f32 to vector<4x128xf32>
    %466 = arith.addf %465, %464 : vector<4x128xf32>
    %467 = arith.mulf %462, %466 : vector<4x128xf32>
    %cst_192 = arith.constant 1.42141378 : f32
    %468 = vector.broadcast %cst_192 : f32 to vector<4x128xf32>
    %469 = arith.addf %468, %467 : vector<4x128xf32>
    %470 = arith.mulf %462, %469 : vector<4x128xf32>
    %cst_193 = arith.constant -0.284496725 : f32
    %471 = vector.broadcast %cst_193 : f32 to vector<4x128xf32>
    %472 = arith.addf %471, %470 : vector<4x128xf32>
    %473 = arith.mulf %462, %472 : vector<4x128xf32>
    %cst_194 = arith.constant 0.254829586 : f32
    %474 = vector.broadcast %cst_194 : f32 to vector<4x128xf32>
    %475 = arith.addf %474, %473 : vector<4x128xf32>
    %476 = arith.mulf %462, %475 : vector<4x128xf32>
    %cst_195 = arith.constant 0.000000e+00 : f32
    %477 = vector.broadcast %cst_195 : f32 to vector<4x128xf32>
    %478 = arith.subf %477, %456 : vector<4x128xf32>
    %479 = arith.mulf %478, %456 : vector<4x128xf32>
    %480 = math.exp %479 : vector<4x128xf32>
    %481 = arith.mulf %476, %480 : vector<4x128xf32>
    %cst_196 = arith.constant 1.000000e+00 : f32
    %482 = vector.broadcast %cst_196 : f32 to vector<4x128xf32>
    %483 = arith.subf %482, %481 : vector<4x128xf32>
    %cst_197 = arith.constant 0.000000e+00 : f32
    %484 = vector.broadcast %cst_197 : f32 to vector<4x128xf32>
    %485 = arith.cmpf oge, %455, %484 : vector<4x128xf32>
    %cst_198 = arith.constant 0.000000e+00 : f32
    %486 = vector.broadcast %cst_198 : f32 to vector<4x128xf32>
    %487 = arith.subf %486, %483 : vector<4x128xf32>
    %488 = arith.select %485, %483, %487 : vector<4x128xi1>, vector<4x128xf32>
    %cst_199 = arith.constant 1.000000e+00 : f32
    %489 = vector.broadcast %cst_199 : f32 to vector<4x128xf32>
    %490 = arith.addf %489, %488 : vector<4x128xf32>
    %491 = arith.mulf %453, %490 : vector<4x128xf32>
    %492 = arith.addf %329, %491 : vector<4x128xf32>
    %493 = vector.broadcast %3 : vector<1x128xf32> to vector<4x128xf32>
    %494 = arith.mulf %492, %493 : vector<4x128xf32>
    %c0_200 = arith.constant 0 : index
    %c0_201 = arith.constant 0 : index
    %c0_202 = arith.constant 0 : index
    %495 = vector.load %arg11[%c0_200, %c0_201, %c0_202] : memref<1x4x128xf32, #tpu.memory_space<vmem>>, vector<1x4x128xf32>
    %496 = vector.shape_cast %495 : vector<1x4x128xf32> to vector<4x128xf32>
    %497 = vector.shape_cast %494 : vector<4x128xf32> to vector<1x4x128xf32>
    tpu.vector_store %arg11[%c0_200, %c0_201, %c0_202], %497 {strides = array<i32>} : memref<1x4x128xf32, #tpu.memory_space<vmem>>, vector<1x4x128xf32>,
    return
  }
  func.func @transform_0(%arg0: i32) -> (i32, i32, i32) {
    %c0_i32 = arith.constant 0 : i32
    %c0_i32_0 = arith.constant 0 : i32
    %c0_i32_1 = arith.constant 0 : i32
    return %arg0, %c0_i32, %c0_i32_0 : i32, i32, i32
  }
  func.func @transform_1(%arg0: i32) -> (i32, i32, i32) {
    %c0_i32 = arith.constant 0 : i32
    %c0_i32_0 = arith.constant 0 : i32
    %c0_i32_1 = arith.constant 0 : i32
    return %arg0, %c0_i32, %c0_i32_0 : i32, i32, i32
  }
  func.func @transform_2(%arg0: i32) -> (i32, i32, i32) {
    %c0_i32 = arith.constant 0 : i32
    %c0_i32_0 = arith.constant 0 : i32
    %c0_i32_1 = arith.constant 0 : i32
    %c0_i32_2 = arith.constant 0 : i32
    return %c0_i32, %c0_i32_0, %c0_i32_1 : i32, i32, i32
  }
  func.func @transform_3(%arg0: i32) -> (i32, i32, i32) {
    %c0_i32 = arith.constant 0 : i32
    %c0_i32_0 = arith.constant 0 : i32
    %c0_i32_1 = arith.constant 0 : i32
    %c0_i32_2 = arith.constant 0 : i32
    return %c0_i32, %c0_i32_0, %c0_i32_1 : i32, i32, i32
  }
  func.func @transform_4(%arg0: i32) -> (i32, i32, i32) {
    %c0_i32 = arith.constant 0 : i32
    %c0_i32_0 = arith.constant 0 : i32
    %c0_i32_1 = arith.constant 0 : i32
    %c0_i32_2 = arith.constant 0 : i32
    return %c0_i32, %c0_i32_0, %c0_i32_1 : i32, i32, i32
  }
  func.func @transform_5(%arg0: i32) -> (i32, i32, i32) {
    %c0_i32 = arith.constant 0 : i32
    %c0_i32_0 = arith.constant 0 : i32
    %c0_i32_1 = arith.constant 0 : i32
    %c0_i32_2 = arith.constant 0 : i32
    return %c0_i32, %c0_i32_0, %c0_i32_1 : i32, i32, i32
  }
  func.func @transform_6(%arg0: i32) -> (i32, i32, i32) {
    %c0_i32 = arith.constant 0 : i32
    %c0_i32_0 = arith.constant 0 : i32
    %c0_i32_1 = arith.constant 0 : i32
    %c0_i32_2 = arith.constant 0 : i32
    return %c0_i32, %c0_i32_0, %c0_i32_1 : i32, i32, i32
  }
  func.func @transform_7(%arg0: i32) -> (i32, i32, i32) {
    %c0_i32 = arith.constant 0 : i32
    %c0_i32_0 = arith.constant 0 : i32
    %c0_i32_1 = arith.constant 0 : i32
    %c0_i32_2 = arith.constant 0 : i32
    return %c0_i32, %c0_i32_0, %c0_i32_1 : i32, i32, i32
  }
  func.func @transform_8(%arg0: i32) -> (i32, i32, i32) {
    %c0_i32 = arith.constant 0 : i32
    %c0_i32_0 = arith.constant 0 : i32
    %c0_i32_1 = arith.constant 0 : i32
    %c0_i32_2 = arith.constant 0 : i32
    return %c0_i32, %c0_i32_0, %c0_i32_1 : i32, i32, i32
  }
  func.func @transform_9(%arg0: i32) -> (i32, i32, i32) {
    %c0_i32 = arith.constant 0 : i32
    %c0_i32_0 = arith.constant 0 : i32
    %c0_i32_1 = arith.constant 0 : i32
    %c0_i32_2 = arith.constant 0 : i32
    return %c0_i32, %c0_i32_0, %c0_i32_1 : i32, i32, i32
  }
  func.func @transform_10(%arg0: i32) -> (i32, i32, i32) {
    %c0_i32 = arith.constant 0 : i32
    %c0_i32_0 = arith.constant 0 : i32
    %c0_i32_1 = arith.constant 0 : i32
    return %arg0, %c0_i32, %c0_i32_0 : i32, i32, i32
  }
}

</mosaic_0001>

<bundles_post_ra>
// kernel: _lambda_.1
= control target key start
LH: loop header
LB: loop body
LE: loop exit
PB: predicated region body
PF: predicated region fallthrough
CT: control target
= control target key end

     0   :  { %s2141_s0 = inlined_call_operand.vmem [shape: f32[2,4,128], index: 0, kind: input, shape index: {}]   ;;  %s2142_s1 = inlined_call_operand.vmem [shape: f32[2,1,128], index: 1, kind: input, shape index: {}]   ;;  %s2143_s2 = inlined_call_operand.hbm [shape: f32[3,4,3], index: 2, kind: input, shape index: {}]   ;;  %s2144_s3 = inlined_call_operand.hbm [shape: f32[3,4,1], index: 3, kind: input, shape index: {}]   ;;  %s2145_s4 = inlined_call_operand.hbm [shape: f32[3,4,4], index: 4, kind: input, shape index: {}]   ;;  %s2146_s5 = inlined_call_operand.hbm [shape: f32[3,4,1], index: 5, kind: input, shape index: {}]   ;;  %s2147_s6 = inlined_call_operand.hbm [shape: f32[3,4,1], index: 6, kind: input, shape index: {}]   ;;  %s2148_s7 = inlined_call_operand.hbm [shape: f32[3,4,1], index: 7, kind: input, shape index: {}]   ;;  %s2149_s8 = inlined_call_operand.vmem [shape: f32[3,4,1], index: 8, kind: input, shape index: {}]   ;;  %s2150_s9 = inlined_call_operand.vmem [shape: f32[3,4,1], index: 9, kind: input, shape index: {}]   ;;  %s2151_s10 = inlined_call_operand.hbm [shape: f32[2,4,128], index: 10, kind: output, shape index: {}]  }
   0x1   :  { %2154 = sst [smem:[#allocation21_spill]] %s2144_s3 }
   0x2   :  { %15 = vsyncpa [#allocation3], 0 }
   0x3   :  { %16 = vsyncpa [#allocation6], 0 }
   0x4   :  { %17 = vsyncpa [#allocation9], 0 }
   0x5   :  { %18 = vsyncpa [#allocation12], 0 }
   0x6   :  { %19 = vsyncpa [#allocation4], 0 }
   0x7   :  { %21 = vsyncpa [#allocation4 + $0x1], 0  ;;  %s1873_s13 = smov 0   ;;  %s1875_s14 = smov 0  }
   0x8   :  { %s1877_s15 = smov 0   ;;  %s1879_s16 = smov 0  }
   0x9 LB: > { %2155 = sst [smem:[#allocation19_spill]] %s1792_s15  ;;  %s1894_s17 = sadd.s32 4294967295, %s1796_s16   ;;  %s1796_s16 = sphi %s1879_s16, %s2175_s16   ;;  %s1792_s15 = sphi %s1877_s15, %s2172_s15   ;;  %s1788_s14 = sphi %s1875_s14, %s2174_s14   ;;  %s1784_s13 = sphi %s1873_s13, %s2173_s13  }
   0xa   : > { %s1348_s18 = sadd.s32 4294967294, %s1796_s16   ;;  %s1898_s19 = sadd.s32 1, %s1796_s16  }
   0xb   : > { %s254_s20 = sadd.s32 1, %s1792_s15  ;;  %s251_s21 = ssub.s32 %s1796_s16, %s1898_s19 }
   0xc   : > { %p264_p0 = scmp.ne.s32.totalorder %s1792_s15, %s1788_s14  ;;  %p252_p1 = scmp.eq.s32.totalorder %s251_s21, 0 }
   0xd   : > { %p265_p2 = scmp.eq.s32.totalorder %s1894_s17, 1  ;;  %p270_p3 = scmp.ne.s32.totalorder %s1788_s14, %s1784_s13 }
   0xe   : > { %p271_p4 = scmp.eq.s32.totalorder %s1348_s18, 1  ;;  %p1349_p7 = scmp.ge.s32.totalorder %s1796_s16, 1 }
   0xf   : > { %s1909_s22 = scalar_select %p252_p1, %s1792_s15, %s254_s20  }
  0x10   : > { %p1911_p5 = por %p265_p2, %p264_p0  ;;  %p1915_p6 = por %p271_p4, %p270_p3 }
  0x11   : > { %2156 = sst [smem:[#allocation20_spill]] %s1909_s22  ;;  %p278_p8 = scmp.lt.s32.totalorder %s1796_s16, 3 }
  0x12   : > { %p2153_p9 = scmp.eq.s32.totalorder %s1894_s17, 0  ;;  %s1798_s26 = smov [#allocation5]  }
  0x13   : > { %p1922_p10 = pnand %p1349_p7, %p278_p8  ;;  %s303_s27 = sshll.u32 %s1798_s26, 4  ;;  %s304_s27 = int_to_ptr.vmem [resolvable:$true] %s303_s27 }
  0x14   : > { %s1799_s29 = smov [#allocation8]   ;;  %s1800_s11 = smov [#allocation2]  }
  0x15   : > { %p1428_p11 = pneg %p1922_p10  ;;  %s329_s30 = sshll.u32 %s1799_s29, 4  ;;  %s330_s30 = int_to_ptr.vmem [resolvable:$true] %s329_s30 }
  0x16   : > { %s290_s12 = sshll.u32 %s1800_s11, 4  ;;  %s1575_s20 = scalar_lea.vmem %s304_s27, 192  ;;  %s291_s12 = int_to_ptr.vmem [resolvable:$true] %s290_s12 }
  0x17   : > { %p1930_p12 = pnand %p2153_p9, %p1428_p11  ;;  %p1576_p0 = scmp.ne.s32.totalorder %s304_s27, %s1575_s20 }
  0x18   : > { %p1583_p3 = scmp.lt.s32.totalorder %s304_s27, %s304_s27  ;;  %p1584_p4 = scmp.lt.s32.totalorder %s1575_s20, %s1575_s20 }
  0x19   : > { %p1936_p13 = pneg %p1930_p12 }
  0x1a   : > { %p1585_p7 = por %p1584_p4, %p1583_p3 }
  0x1b   : > { %p1578_p1 = pnand %p1576_p0, %p1936_p13 }
  0x1d   : > { %p1579_p2 = pneg %p1578_p1 }
  0x1f   : > { %p1586_p8 = pnand %p1585_p7, %p1579_p2 }
  0x21   : > { %1589 = shalt.err (!%p1586_p8)
}
  0x22   : > { %s1801_s21 = smov 64   ;;  %s1802_s26 = smov 4  }
  0x23   : > { %s2162_s3 = sld [smem:[#allocation21_spill]]  ;;  %s1601_s22 = scalar_lea.vmem %s330_s30, 192 }
  0x24   : > { %p1602_p11 = scmp.ne.s32.totalorder %s330_s30, %s1601_s22  ;;  %p1609_p3 = scmp.lt.s32.totalorder %s330_s30, %s330_s30 }
  0x25   : > { %p1610_p2 = scmp.lt.s32.totalorder %s1601_s22, %s1601_s22 }
  0x26   : > { %p1604_p0 = pnand %p1602_p11, %p1936_p13 }
  0x27   : > { %p1611_p4 = por %p1610_p2, %p1609_p3 }
  0x28   : > { %p1605_p1 = pneg %p1604_p0 }
  0x29   : > { %1434 = dma.hbm_to_vmem [thread:$0]  (!%p1930_p12), %s2162_s3, 192, %s304_s27, [#allocation6], %s1801_s21, %s1801_s21, %s1802_s26  }
  0x2a   : > { %p1612_p7 = pnand %p1611_p4, %p1605_p1 }
  0x2c   : > { %1615 = shalt.err (!%p1612_p7)
}
  0x2d   : > { %1440 = dma.hbm_to_vmem [thread:$0]  (!%p1930_p12), %s2146_s5, 192, %s330_s30, [#allocation9], %s1801_s21, %s1801_s21, %s1802_s26  }
  0x2e   : > { %s1627_s27 = scalar_lea.vmem %s291_s12, 192  ;;  %p1635_p9 = scmp.lt.s32.totalorder %s291_s12, %s291_s12 }
  0x2f   : > { %p1628_p8 = scmp.ne.s32.totalorder %s291_s12, %s1627_s27  ;;  %p1636_p3 = scmp.lt.s32.totalorder %s1627_s27, %s1627_s27 }
  0x31   : > { %p1630_p11 = pnand %p1628_p8, %p1936_p13  ;;  %p1637_p1 = por %p1636_p3, %p1635_p9 }
  0x33   : > { %p1631_p0 = pneg %p1630_p11 }
  0x35   : > { %p1638_p2 = pnand %p1637_p1, %p1631_p0 }
  0x37   : > { %1641 = shalt.err (!%p1638_p2)
}
  0x38   : > { %1431 = dma.hbm_to_vmem [thread:$0]  (!%p1930_p12), %s2143_s2, 192, %s291_s12, [#allocation3], %s1801_s21, %s1801_s21, %s1802_s26  }
  0x39   : > { %s1803_s30 = smov [#allocation7]   ;;  %s1804_s11 = smov [#allocation10]  }
  0x3a   : > { %s316_s29 = sshll.u32 %s1803_s30, 4  ;;  %s342_s20 = sshll.u32 %s1804_s11, 4  ;;  %s317_s29 = int_to_ptr.vmem [resolvable:$true] %s316_s29  ;;  %s343_s20 = int_to_ptr.vmem [resolvable:$true] %s342_s20 }
  0x3b   : > { %s1653_s3 = scalar_lea.vmem %s317_s29, 192  ;;  %p1661_p8 = scmp.lt.s32.totalorder %s317_s29, %s317_s29 }
  0x3c   : > { %p1654_p4 = scmp.ne.s32.totalorder %s317_s29, %s1653_s3  ;;  %p1662_p11 = scmp.lt.s32.totalorder %s1653_s3, %s1653_s3 }
  0x3e   : > { %p1656_p9 = pnand %p1654_p4, %p1936_p13  ;;  %p1663_p0 = por %p1662_p11, %p1661_p8 }
  0x40   : > { %p1657_p7 = pneg %p1656_p9 }
  0x42   : > { %p1664_p3 = pnand %p1663_p0, %p1657_p7 }
  0x44   : > { %1667 = shalt.err (!%p1664_p3)
}
  0x45   : > { %1437 = dma.hbm_to_vmem [thread:$0]  (!%p1930_p12), %s2145_s4, 192, %s317_s29, [#allocation6], %s1801_s21, %s1801_s21, %s1802_s26  }
  0x46   : > { %s1679_s22 = scalar_lea.vmem %s343_s20, 192  ;;  %p1687_p9 = scmp.lt.s32.totalorder %s343_s20, %s343_s20 }
  0x47   : > { %p1680_p1 = scmp.ne.s32.totalorder %s343_s20, %s1679_s22  ;;  %p1688_p8 = scmp.lt.s32.totalorder %s1679_s22, %s1679_s22 }
  0x49   : > { %p1682_p2 = pnand %p1680_p1, %p1936_p13  ;;  %p1689_p7 = por %p1688_p8, %p1687_p9 }
  0x4b   : > { %p1683_p4 = pneg %p1682_p2 }
  0x4d   : > { %p1690_p11 = pnand %p1689_p7, %p1683_p4 }
  0x4f   : > { %1693 = shalt.err (!%p1690_p11)
}
  0x50   : > { %1443 = dma.hbm_to_vmem [thread:$0]  (!%p1930_p12), %s2147_s6, 192, %s343_s20, [#allocation9], %s1801_s21, %s1801_s21, %s1802_s26  }
  0x51   : > { %s1805_s30 = smov [#allocation11]  }
  0x52   : > { %s355_s29 = sshll.u32 %s1805_s30, 4  ;;  %s356_s29 = int_to_ptr.vmem [resolvable:$true] %s355_s29 }
  0x53   : > { %s1705_s11 = scalar_lea.vmem %s356_s29, 192  ;;  %p1713_p2 = scmp.lt.s32.totalorder %s356_s29, %s356_s29 }
  0x54   : > { %p1706_p0 = scmp.ne.s32.totalorder %s356_s29, %s1705_s11  ;;  %p1714_p4 = scmp.lt.s32.totalorder %s1705_s11, %s1705_s11 }
  0x56   : > { %p1708_p3 = pnand %p1706_p0, %p1936_p13  ;;  %p1715_p9 = por %p1714_p4, %p1713_p2 }
  0x58   : > { %p1709_p1 = pneg %p1708_p3 }
  0x5a   : > { %p1716_p8 = pnand %p1715_p9, %p1709_p1 }
  0x5c   : > { %1719 = shalt.err (!%p1716_p8)
}
  0x5d   : > { %1446 = dma.hbm_to_vmem [thread:$0]  (!%p1930_p12), %s2148_s7, 192, %s356_s29, [#allocation12], %s1801_s21, %s1801_s21, %s1802_s26  }
  0x5e   : > { %390 = sbr.rel (%p1922_p10) target bundleno = 1761 (0x6e1), region = 60  ;;  %p2163_p13 = scmp.eq.s32.totalorder (!%p1922_p10), %s1894_s17, 0 }
  0x63   : > { %1763 = dma.done.wait (%p2163_p13), [#allocation3], 192   ;;  %p2164_p7 = pmov %p2163_p13 }
  0x65   : > { %1765 = vsyncadd (%p2164_p7), [#allocation3], 4294967104  ;;  %p2165_p11 = pmov %p2164_p7 }
  0x66   : > { %p2166_p0 = pmov %p2164_p7 }
  0x67   : > { %1767 = dma.done.wait (%p2165_p11), [#allocation6], 384  }
  0x68   : > { %1769 = vsyncadd (%p2166_p0), [#allocation6], 4294966912  ;;  %p2167_p3 = pmov %p2166_p0 }
  0x69   : > { %p2168_p12 = pmov %p2166_p0 }
  0x6a   : > { %1771 = dma.done.wait (%p2167_p3), [#allocation9], 384  }
  0x6b   : > { %1773 = vsyncadd (%p2168_p12), [#allocation9], 4294966912  ;;  %p2169_p10 = pmov %p2166_p0 }
  0x6c   : > { %p2170_p1 = pmov %p2166_p0 }
  0x6d   : > { %1775 = dma.done.wait (%p2169_p10), [#allocation12], 192  }
  0x6e   : > { %1777 = vsyncadd (%p2170_p1), [#allocation12], 4294967104  ;;  %p450_p2 = scmp.lt.s32.totalorder %s1894_s17, 1  ;;  %v1806_v0 = vmov 2   ;;  %v1807_v1 = vmov 0   ;;  %v1808_v6 = vmov 1  }
  0x6f   : > { %1517 = vset.pattern.permute.xlu1 %v1806_v0  ;;  %1515 = vset.pattern.permute.xlu0 %v1807_v1  ;;  %v466_v2 = vld [vmem:[#allocation2] sm:$0xf]  ;;  %s1809_s15 = smov 1   ;;  %v490_v7 = vld [vmem:[#allocation5] sm:$0xf]  ;;  %s1810_s30 = smov 127  }
  0x70   : > { %s451_s25 = scalar_select %p450_p2, %s1894_s17, 1  ;;  %485 = vperm.xlu1 %1517, %v466_v2   ;;  %471 = vperm.xlu0 %1515, %v466_v2   ;;  %v497_v8 = vld [vmem:[#allocation10] sm:$0xf]  ;;  %v498_v9 = vld [vmem:[#allocation11] sm:$0xf]  ;;  %v1811_v14 = vmov 0.0  }
  0x71   : > { %v562_v10 = vld [vmem:[#allocation8] sm:$0xf]  ;;  %v646_v11 = vld [vmem:[%s2150_s9] sm:$0xf]  ;;  %1387 = vmatprep.subr.mxu0 %v1811_v14  ;;  %1392 = vmatprep.subr.mxu1 %v1811_v14  ;;  %vm1812_vm0 = vmmov 0   ;;  %vm499_vm1 = vcmask 1043456  }
  0x72   : > { %s1365_s28 = sshll.u32 %s451_s25, 2  ;;  %s456_s26 = scalar_lea.vmem %s2142_s1, %s451_s25  ;;  %v645_v12 = vld [vmem:[%s2149_s8] sm:$0xf]  ;;  %v710_v13 = vld [vmem:[#allocation2 + $0x4] sm:$0xf]  ;;  %1389 = vmatprep.mubr.msk.f32.mxu0 %vm1812_vm0, %v1811_v14  ;;  %1394 = vmatprep.mubr.msk.f32.mxu1 %vm1812_vm0, %v1811_v14  ;;  %vm568_vm3 = vcmask 31744  }
  0x73   : > { %s453_s3 = scalar_lea.vmem %s2141_s0, %s1365_s28  ;;  %v2030_v4 = vld [vmem:[%s456_s26] ss:$0 sm:$0xff]  ;;  %s1813_s18 = smov 3  }
  0x74   : > { %v2028_v3 = vld [vmem:[%s453_s3] sm:$0xf]  ;;  %1516 = vset.pattern.permute.xlu0 %v1808_v6  ;;  %1518 = vset.pattern.permute.xlu1 %v1807_v1  ;;  %s1814_s21 = smov 125   ;;  %s1815_s22 = smov 119  }
  0x75   : > { %v465_v5 = vmul.f32 %v2030_v4, %v2028_v3  ;;  %477 = vperm.xlu0 %1516, %v466_v2   ;;  %s1816_s3 = smov 9   ;;  %s447_s12 = sand.u32 1, %s1788_s14  }
  0x76   : > { %s1364_s20 = sshll.u32 %s447_s12, 2  ;;  %s1378_s25 = sshll.u32 %s1894_s17, 6 }
  0x77   : > { %467 = vrot.lane.b32.xlu1 %v465_v5, %s1809_s15  ;;  %s449_s28 = scalar_lea.vmem [#allocation13], %s1364_s20  ;;  %s1218_s27 = scalar_lea.hbm %s2151_s10, %s1378_s25 }
  0x78   : > { %s1817_s15 = smov [#allocation13]  }
  0x79   : > { %482 = vrot.lane.b32.xlu0 %v465_v5, %s1810_s30  ;;  %s1724_s17 = sshll.u32 %s1817_s15, 4  ;;  %s1725_s17 = int_to_ptr.vmem [resolvable:$false] %s1724_s17 }
  0x7a   : > { %1519 = vset.pattern.permute.xlu0 %v1807_v1  ;;  %s1726_s30 = scalar_lea.vmem %s1725_s17, 128 }
  0x7b   : > { %493 = vperm.xlu1 %1518, %v490_v7  }
  0x7d   : > { %530 = vperm.xlu0 %1519, %v498_v9  }
  0x7f   : > { %524 = vperm.xlu1 %1518, %v497_v8  }
  0x81   : > { %676 = vperm.xlu0 %1519, %v646_v11  }
  0x83   : > { %565 = vperm.xlu1 %1518, %v562_v10  }
  0x85   : > { %1520 = vset.pattern.permute.xlu0 %v1808_v6 }
  0x86   : > { %721 = vperm.xlu0 %1520, %v710_v13  }
  0x87   : > { %670 = vperm.xlu1 %1518, %v645_v12  }
  0x8a   : > { %1522 = vset.pattern.permute.xlu0 %v1807_v1 }
  0x8b   : > { %715 = vperm.xlu1 %1518, %v710_v13  }
  0x8f   : > { %1521 = vset.pattern.permute.xlu1 %v1806_v0 }
  0x90   : > { %729 = vperm.xlu1 %1521, %v710_v13  }
  0x94   : > { %1523 = vset.pattern.permute.xlu1 %v1807_v1 }
  0xeb   : > { %v486_v15 = vpop.permute.xlu1 %485  ;;  %v472_v16 = vpop.permute.xlu0 %471 }
  0xef   : > { %v468_v17 = vpop.permute.xlu1 %467 }
  0xf0   : > { %v478_v18 = vpop.permute.xlu0 %477  ;;  %v474_v19 = vmul.f32 %v472_v16, %v468_v17 }
  0xf1   : > { %v480_v20 = vmul.f32 %v478_v18, %v465_v5 }
  0xf3   : > { %v481_v22 = vadd.f32 %v480_v20, %v474_v19  ;;  %v561_v19 = vld [vmem:[#allocation7] sm:$0xf]  ;;  %v735_v20 = vld [vmem:[#allocation5 + $0x4] sm:$0xf] }
  0xf4   : > { %v483_v21 = vpop.permute.xlu0 %482  ;;  %738 = vperm.xlu0 %1522, %v735_v20   ;;  %v743_v20 = vld [vmem:[#allocation10 + $0x4] sm:$0xf] }
  0xf5   : > { %v488_v23 = vmul.f32 %v486_v15, %v483_v21  ;;  %v745_v21 = vld [vmem:[#allocation11 + $0x4] sm:$0xf] }
  0xf6   : > { %v494_v25 = vpop.permute.xlu1 %493 }
  0xf7   : > { %v489_v24 = vadd.f32 %v488_v23, %v481_v22  ;;  %v1371_v22 = vld [vmem:[%s2149_s8 + $0x4] sm:$0xf]  ;;  %v2063_v23 = vld [vmem:[#allocation2 + $0x8] sm:$0xf] }
  0xf8   : > { %v531_v50 = vpop.permute.xlu0 %530  ;;  %775 = vperm.xlu0 %1522, %v745_v21   ;;  %v809_v21 = vld [vmem:[#allocation8 + $0x4] sm:$0xf] }
  0xf9   : > { %v496_v26 = vadd.f32 %v494_v25, %v489_v24 }
  0xfa   : > { %v525_v48 = vpop.permute.xlu1 %524 }
  0xfb   : > { %v500_v27 = vsel %vm499_vm1, %v496_v26, 0.0 }
  0xfc   : > { %v501_v28 = vrot.slane %v500_v27, 4  ;;  %918 = vperm.xlu0 %1522, %v1371_v22   ;;  %v1372_v22 = vld [vmem:[%s2150_s9 + $0x4] sm:$0xf] }
  0xfe   : > { %v502_v29 = vadd.f32 %v501_v28, %v500_v27 }
 0x100   : > { %v503_v30 = vrot.slane %v502_v29, 2  ;;  %963 = vperm.xlu0 %1522, %v2063_v23  }
 0x102   : > { %v504_v31 = vadd.f32 %v503_v30, %v502_v29 }
 0x104   : > { %v505_v32 = vrot.slane %v504_v31, 1  ;;  %1525 = vset.pattern.permute.xlu0 %v1806_v0 }
 0x105   : > { %977 = vperm.xlu0 %1525, %v2063_v23  }
 0x106   : > { %v506_v33 = vadd.f32 %v505_v32, %v504_v31 }
 0x108   : > { %v508_v34 = vmul.f32 0.25, %v506_v33 }
 0x109   : > { %1527 = vset.pattern.permute.xlu0 %v1807_v1 }
 0x10a   : > { %v509_v35 = vsub.f32 %v496_v26, %v508_v34 }
 0x10c   : > { %v510_v36 = vmul.f32 %v509_v35, %v509_v35 }
 0x10e   : > { %v511_v37 = vsel %vm499_vm1, %v510_v36, 0.0 }
 0x10f   : > { %v512_v38 = vrot.slane %v511_v37, 4 }
 0x111   : > { %v513_v39 = vadd.f32 %v512_v38, %v511_v37 }
 0x113   : > { %v514_v40 = vrot.slane %v513_v39, 2 }
 0x115   : > { %v515_v41 = vadd.f32 %v514_v40, %v513_v39 }
 0x117   : > { %v516_v42 = vrot.slane %v515_v41, 1 }
 0x119   : > { %v517_v43 = vadd.f32 %v516_v42, %v515_v41 }
 0x11b   : > { %v518_v44 = vmul.f32 0.25, %v517_v43 }
 0x11d   : > { %v519_v45 = vadd.f32 1e-05, %v518_v44 }
 0x11f   : > { %1528 = vrsqrt.f32 %v519_v45 }
 0x12c   : > { %v1529_v46 = vpop.eup %1528 }
 0x12d   : > { %v521_v47 = vmul.f32 %v1529_v46, %v509_v35 }
 0x12f   : > { %v527_v49 = vmul.f32 %v525_v48, %v521_v47 }
 0x131   : > { %v533_v51 = vadd.f32 %v531_v50, %v527_v49  ;;  %v677_v49 = vpop.permute.xlu0 %676 }
 0x133   : > { %v535_v52 = vmul.f32 0.70710677, %v533_v51  ;;  %v534_v16 = vmul.f32 0.5, %v533_v51 }
 0x135   : > { %v536_v53 = vand.u32 2147483647, %v535_v52  ;;  %vm556_vm2 = vcmp.ge.f32.partialorder %v535_v52, 0.0 }
 0x137   : > { %v537_v54 = vmul.f32 0.3275911, %v536_v53  ;;  %v550_v56 = vsub.f32 0.0, %v536_v53 }
 0x139   : > { %v538_v55 = vadd.f32 1.0, %v537_v54  ;;  %v551_v57 = vmul.f32 %v550_v56, %v536_v53 }
 0x13b   : > { %1530 = vrcp.f32 %v538_v55  ;;  %v552_v59 = vmul.f32 1.442695, %v551_v57 }
 0x13d   : > { %1532 = vpow2.f32 %v552_v59 }
 0x148   : > { %v1531_v58 = vpop.eup %1530 }
 0x149   : > { %v541_v60 = vmul.f32 1.0614054, %v1531_v58 }
 0x14a   : > { %v1533_v10 = vpop.eup %1532 }
 0x14b   : > { %v542_v61 = vadd.f32 -1.4531521, %v541_v60 }
 0x14d   : > { %v543_v62 = vmul.f32 %v1531_v58, %v542_v61 }
 0x14f   : > { %v544_v63 = vadd.f32 1.4214138, %v543_v62 }
 0x151   : > { %v545_v2 = vmul.f32 %v1531_v58, %v544_v63 }
 0x153   : > { %v546_v5 = vadd.f32 -0.28449672, %v545_v2 }
 0x155   : > { %v547_v7 = vmul.f32 %v1531_v58, %v546_v5 }
 0x157   : > { %v548_v8 = vadd.f32 0.2548296, %v547_v7 }
 0x159   : > { %v549_v9 = vmul.f32 %v1531_v58, %v548_v8 }
 0x15b   : > { %v554_v11 = vmul.f32 %v1533_v10, %v549_v9 }
 0x15d   : > { %v555_v12 = vsub.f32 1.0, %v554_v11 }
 0x15f   : > { %v557_v13 = vsub.f32 0.0, %v555_v12 }
 0x161   : > { %v558_v15 = vsel %vm556_vm2, %v555_v12, %v557_v13 }
 0x162   : > { %v559_v17 = vadd.f32 1.0, %v558_v15 }
 0x164   : > { %v560_v18 = vmul.f32 %v559_v17, %v534_v16 }
 0x166   : > { %1388 = vmatpush3.msk.msra.mxu0 %vm499_vm1, %v560_v18 }
 0x167   : > { %1390 = vmatmul.mubr.msk.f32.vlgmr.msra.gmra.mxu0 %vm568_vm3, %v561_v19  ;;  %1397 = vmatprep.subr.mxu0 %v1811_v14 }
 0x168   : > { %1399 = vmatprep.mubr.msk.f32.mxu0 %vm1812_vm0, %v1811_v14  ;;  %v566_v14 = vpop.permute.xlu1 %565 }
 0x16c   : > { %v671_v47 = vpop.permute.xlu1 %670 }
 0x227   : > { %v641_v24 = vpop.f32.mrf.mxu0 }
 0x228   : > { %v642_v25 = vadd.f32 %v641_v24, %v566_v14  ;;  %v722_v24 = vpop.permute.xlu0 %721 }
 0x229   : > { %v1391_v26 = vpop.f32.mrf.mxu0 }
 0x22a   : > { %v647_v27 = vsel %vm499_vm1, %v642_v25, 0.0 }
 0x22b   : > { %v648_v28 = vrot.slane %v647_v27, 4 }
 0x22d   : > { %v649_v29 = vadd.f32 %v648_v28, %v647_v27 }
 0x22f   : > { %v650_v30 = vrot.slane %v649_v29, 2 }
 0x231   : > { %v651_v31 = vadd.f32 %v650_v30, %v649_v29 }
 0x233   : > { %v652_v32 = vrot.slane %v651_v31, 1 }
 0x235   : > { %v653_v33 = vadd.f32 %v652_v32, %v651_v31  ;;  %v739_v32 = vpop.permute.xlu0 %738 }
 0x237   : > { %v654_v34 = vmul.f32 0.25, %v653_v33 }
 0x239   : > { %v655_v35 = vsub.f32 %v642_v25, %v654_v34 }
 0x23b   : > { %v656_v36 = vmul.f32 %v655_v35, %v655_v35 }
 0x23d   : > { %v657_v0 = vsel %vm499_vm1, %v656_v36, 0.0 }
 0x23e   : > { %v658_v37 = vrot.slane %v657_v0, 4 }
 0x240   : > { %v659_v38 = vadd.f32 %v658_v37, %v657_v0 }
 0x242   : > { %v660_v39 = vrot.slane %v659_v38, 2 }
 0x244   : > { %v661_v40 = vadd.f32 %v660_v39, %v659_v38 }
 0x246   : > { %v662_v41 = vrot.slane %v661_v40, 1 }
 0x248   : > { %v663_v42 = vadd.f32 %v662_v41, %v661_v40 }
 0x24a   : > { %v664_v43 = vmul.f32 0.25, %v663_v42 }
 0x24c   : > { %v665_v44 = vadd.f32 1e-05, %v664_v43 }
 0x24e   : > { %1534 = vrsqrt.f32 %v665_v44 }
 0x25b   : > { %v1535_v45 = vpop.eup %1534 }
 0x25c   : > { %v667_v46 = vmul.f32 %v1535_v45, %v655_v35 }
 0x25e   : > { %v673_v48 = vmul.f32 %v671_v47, %v667_v46 }
 0x260   : > { %v679_v50 = vadd.f32 %v677_v49, %v673_v48 }
 0x262   : > { %v681_v51 = vmul.f32 0.70710677, %v679_v50  ;;  %v680_v15 = vmul.f32 0.5, %v679_v50 }
 0x264   : > { %v682_v52 = vand.u32 2147483647, %v681_v51  ;;  %vm702_vm4 = vcmp.ge.f32.partialorder %v681_v51, 0.0 }
 0x266   : > { %v683_v53 = vmul.f32 0.3275911, %v682_v52  ;;  %v696_v55 = vsub.f32 0.0, %v682_v52 }
 0x268   : > { %v684_v54 = vadd.f32 1.0, %v683_v53  ;;  %v697_v56 = vmul.f32 %v696_v55, %v682_v52  ;;  %v776_v53 = vpop.permute.xlu0 %775 }
 0x26a   : > { %1536 = vrcp.f32 %v684_v54  ;;  %v698_v58 = vmul.f32 1.442695, %v697_v56 }
 0x26c   : > { %1538 = vpow2.f32 %v698_v58 }
 0x277   : > { %v1537_v57 = vpop.eup %1536 }
 0x278   : > { %v687_v59 = vmul.f32 1.0614054, %v1537_v57 }
 0x279   : > { %v1539_v9 = vpop.eup %1538 }
 0x27a   : > { %v688_v60 = vadd.f32 -1.4531521, %v687_v59 }
 0x27c   : > { %v689_v61 = vmul.f32 %v1537_v57, %v688_v60 }
 0x27e   : > { %v690_v62 = vadd.f32 1.4214138, %v689_v61 }
 0x280   : > { %v691_v63 = vmul.f32 %v1537_v57, %v690_v62 }
 0x282   : > { %v692_v2 = vadd.f32 -0.28449672, %v691_v63 }
 0x284   : > { %v693_v5 = vmul.f32 %v1537_v57, %v692_v2 }
 0x286   : > { %v694_v7 = vadd.f32 0.2548296, %v693_v5 }
 0x288   : > { %v695_v8 = vmul.f32 %v1537_v57, %v694_v7 }
 0x28a   : > { %v700_v10 = vmul.f32 %v1539_v9, %v695_v8 }
 0x28c   : > { %v701_v11 = vsub.f32 1.0, %v700_v10 }
 0x28e   : > { %v703_v12 = vsub.f32 0.0, %v701_v11 }
 0x290   : > { %v704_v13 = vsel %vm702_vm4, %v701_v11, %v703_v12 }
 0x291   : > { %v705_v16 = vadd.f32 1.0, %v704_v13 }
 0x293   : > { %v706_v17 = vmul.f32 %v705_v16, %v680_v15 }
 0x295   : > { %v2072_v18 = vadd.f32 %v706_v17, %v2028_v3  ;;  %v716_v3 = vpop.permute.xlu1 %715 }
 0x297   : > { %v708_v19 = vmul.f32 %v2030_v4, %v2072_v18 }
 0x299   : > { %711 = vrot.lane.b32.xlu1 %v708_v19, %s1813_s18  ;;  %v730_v14 = vpop.permute.xlu1 %729  ;;  %v724_v27 = vmul.f32 %v722_v24, %v708_v19  ;;  %s1220_s18 = sshll.u32 %s449_s28, 4  ;;  %s1221_s18 = int_to_ptr.vmem [resolvable:$true] %s1220_s18 }
 0x29a   : > { %p1727_p13 = scmp.lt.s32.totalorder %s1221_s18, %s1725_s17 }
 0x29d   : > { %726 = vrot.lane.b32.xlu1 %v708_v19, %s1814_s21 }
 0x2a1   : > { %769 = vperm.xlu1 %1523, %v743_v20  }
 0x2a5   : > { %812 = vperm.xlu1 %1523, %v809_v21  }
 0x2a9   : > { %924 = vperm.xlu1 %1523, %v1372_v22  }
 0x2ad   : > { %1524 = vset.pattern.permute.xlu1 %v1808_v6 }
 0x2ae   : > { %969 = vperm.xlu1 %1524, %v2063_v23  }
 0x2b2   : > { %1526 = vset.pattern.permute.xlu1 %v1807_v1 }
 0x30b   : > { %v712_v25 = vpop.permute.xlu1 %711 }
 0x30c   : > { %v718_v26 = vmul.f32 %v716_v3, %v712_v25  ;;  %v807_v3 = vld [vmem:[#allocation7 + $0x4] sm:$0xf] }
 0x30e   : > { %v725_v29 = vadd.f32 %v724_v27, %v718_v26 }
 0x30f   : > { %v727_v28 = vpop.permute.xlu1 %726 }
 0x310   : > { %v732_v30 = vmul.f32 %v730_v14, %v727_v28 }
 0x312   : > { %v733_v31 = vadd.f32 %v732_v30, %v725_v29 }
 0x314   : > { %v741_v33 = vadd.f32 %v739_v32, %v733_v31 }
 0x316   : > { %v746_v34 = vsel %vm499_vm1, %v741_v33, 0.0 }
 0x317   : > { %v747_v35 = vrot.slane %v746_v34, 4 }
 0x319   : > { %v748_v6 = vadd.f32 %v747_v35, %v746_v34 }
 0x31b   : > { %v749_v36 = vrot.slane %v748_v6, 2 }
 0x31c   : > { %v770_v51 = vpop.permute.xlu1 %769 }
 0x31d   : > { %v750_v23 = vadd.f32 %v749_v36, %v748_v6 }
 0x31f   : > { %v751_v0 = vrot.slane %v750_v23, 1 }
 0x320   : > { %v813_v14 = vpop.permute.xlu1 %812 }
 0x321   : > { %v752_v1 = vadd.f32 %v751_v0, %v750_v23 }
 0x323   : > { %v753_v37 = vmul.f32 0.25, %v752_v1 }
 0x325   : > { %v754_v38 = vsub.f32 %v741_v33, %v753_v37 }
 0x327   : > { %v755_v39 = vmul.f32 %v754_v38, %v754_v38 }
 0x329   : > { %v756_v40 = vsel %vm499_vm1, %v755_v39, 0.0 }
 0x32a   : > { %v757_v41 = vrot.slane %v756_v40, 4 }
 0x32c   : > { %v758_v42 = vadd.f32 %v757_v41, %v756_v40 }
 0x32e   : > { %v759_v43 = vrot.slane %v758_v42, 2 }
 0x330   : > { %v760_v44 = vadd.f32 %v759_v43, %v758_v42 }
 0x332   : > { %v761_v45 = vrot.slane %v760_v44, 1 }
 0x334   : > { %v762_v46 = vadd.f32 %v761_v45, %v760_v44  ;;  %v919_v44 = vpop.permute.xlu0 %918 }
 0x336   : > { %v763_v47 = vmul.f32 0.25, %v762_v46  ;;  %v925_v46 = vpop.permute.xlu1 %924 }
 0x338   : > { %v764_v48 = vadd.f32 1e-05, %v763_v47 }
 0x33a   : > { %1540 = vrsqrt.f32 %v764_v48 }
 0x347   : > { %v1541_v49 = vpop.eup %1540 }
 0x348   : > { %v766_v50 = vmul.f32 %v1541_v49, %v754_v38 }
 0x34a   : > { %v772_v52 = vmul.f32 %v770_v51, %v766_v50 }
 0x34c   : > { %v778_v54 = vadd.f32 %v776_v53, %v772_v52 }
 0x34e   : > { %v780_v55 = vmul.f32 0.70710677, %v778_v54  ;;  %v779_v20 = vmul.f32 0.5, %v778_v54 }
 0x350   : > { %v781_v56 = vand.u32 2147483647, %v780_v55  ;;  %vm801_vm5 = vcmp.ge.f32.partialorder %v780_v55, 0.0 }
 0x352   : > { %v782_v57 = vmul.f32 0.3275911, %v781_v56  ;;  %v795_v59 = vsub.f32 0.0, %v781_v56 }
 0x354   : > { %v783_v58 = vadd.f32 1.0, %v782_v57  ;;  %v796_v60 = vmul.f32 %v795_v59, %v781_v56 }
 0x356   : > { %1542 = vrcp.f32 %v783_v58  ;;  %v797_v62 = vmul.f32 1.442695, %v796_v60 }
 0x358   : > { %1544 = vpow2.f32 %v797_v62 }
 0x363   : > { %v1543_v61 = vpop.eup %1542 }
 0x364   : > { %v786_v63 = vmul.f32 1.0614054, %v1543_v61 }
 0x365   : > { %v1545_v13 = vpop.eup %1544 }
 0x366   : > { %v787_v2 = vadd.f32 -1.4531521, %v786_v63 }
 0x368   : > { %v788_v5 = vmul.f32 %v1543_v61, %v787_v2 }
 0x36a   : > { %v789_v7 = vadd.f32 1.4214138, %v788_v5 }
 0x36c   : > { %v790_v8 = vmul.f32 %v1543_v61, %v789_v7 }
 0x36e   : > { %v791_v9 = vadd.f32 -0.28449672, %v790_v8 }
 0x370   : > { %v792_v10 = vmul.f32 %v1543_v61, %v791_v9 }
 0x372   : > { %v793_v11 = vadd.f32 0.2548296, %v792_v10 }
 0x374   : > { %v794_v12 = vmul.f32 %v1543_v61, %v793_v11 }
 0x376   : > { %v799_v15 = vmul.f32 %v1545_v13, %v794_v12 }
 0x378   : > { %v800_v16 = vsub.f32 1.0, %v799_v15 }
 0x37a   : > { %v802_v17 = vsub.f32 0.0, %v800_v16 }
 0x37c   : > { %v803_v19 = vsel %vm801_vm5, %v800_v16, %v802_v17  ;;  %v983_v17 = vld [vmem:[#allocation5 + $0x8] sm:$0xf] }
 0x37d   : > { %v804_v21 = vadd.f32 1.0, %v803_v19  ;;  %v993_v19 = vld [vmem:[#allocation11 + $0x8] sm:$0xf] }
 0x37f   : > { %v805_v22 = vmul.f32 %v804_v21, %v779_v20  ;;  %v991_v20 = vld [vmem:[#allocation10 + $0x8] sm:$0xf]  ;;  %v1376_v21 = vld [vmem:[%s2150_s9 + $0x8] sm:$0xf] }
 0x381   : > { %1393 = vmatpush3.msk.msra.mxu1 %vm499_vm1, %v805_v22  ;;  %v1375_v22 = vld [vmem:[%s2149_s8 + $0x8] sm:$0xf] }
 0x382   : > { %1395 = vmatmul.mubr.msk.f32.vlgmr.msra.gmra.mxu1 %vm568_vm3, %v807_v3  ;;  %v964_v3 = vpop.permute.xlu0 %963 }
 0x442   : > { %v887_v24 = vpop.f32.mrf.mxu1 }
 0x443   : > { %v888_v25 = vadd.f32 %v887_v24, %v813_v14  ;;  %v970_v14 = vpop.permute.xlu1 %969  ;;  %v978_v24 = vpop.permute.xlu0 %977 }
 0x444   : > { %v1396_v26 = vpop.f32.mrf.mxu1 }
 0x445   : > { %v895_v27 = vsel %vm499_vm1, %v888_v25, 0.0 }
 0x446   : > { %v896_v28 = vrot.slane %v895_v27, 4 }
 0x448   : > { %v897_v29 = vadd.f32 %v896_v28, %v895_v27 }
 0x44a   : > { %v898_v30 = vrot.slane %v897_v29, 2 }
 0x44c   : > { %v899_v31 = vadd.f32 %v898_v30, %v897_v29 }
 0x44e   : > { %v900_v32 = vrot.slane %v899_v31, 1 }
 0x450   : > { %v901_v33 = vadd.f32 %v900_v32, %v899_v31 }
 0x452   : > { %v902_v34 = vmul.f32 0.25, %v901_v33 }
 0x454   : > { %v903_v35 = vsub.f32 %v888_v25, %v902_v34 }
 0x456   : > { %v904_v6 = vmul.f32 %v903_v35, %v903_v35 }
 0x458   : > { %v905_v36 = vsel %vm499_vm1, %v904_v6, 0.0 }
 0x459   : > { %v906_v23 = vrot.slane %v905_v36, 4 }
 0x45b   : > { %v907_v0 = vadd.f32 %v906_v23, %v905_v36 }
 0x45d   : > { %v908_v1 = vrot.slane %v907_v0, 2 }
 0x45f   : > { %v909_v37 = vadd.f32 %v908_v1, %v907_v0 }
 0x461   : > { %v910_v38 = vrot.slane %v909_v37, 1 }
 0x463   : > { %v911_v39 = vadd.f32 %v910_v38, %v909_v37 }
 0x465   : > { %v912_v40 = vmul.f32 0.25, %v911_v39 }
 0x467   : > { %v913_v41 = vadd.f32 1e-05, %v912_v40 }
 0x469   : > { %1546 = vrsqrt.f32 %v913_v41 }
 0x476   : > { %v1547_v42 = vpop.eup %1546 }
 0x477   : > { %v915_v43 = vmul.f32 %v1547_v42, %v903_v35 }
 0x479   : > { %v921_v45 = vmul.f32 %v919_v44, %v915_v43 }
 0x47b   : > { %v927_v47 = vadd.f32 %v925_v46, %v921_v45 }
 0x47d   : > { %v929_v48 = vmul.f32 0.70710677, %v927_v47  ;;  %v928_v11 = vmul.f32 0.5, %v927_v47 }
 0x47f   : > { %v930_v49 = vand.u32 2147483647, %v929_v48  ;;  %vm950_vm6 = vcmp.ge.f32.partialorder %v929_v48, 0.0 }
 0x481   : > { %v931_v50 = vmul.f32 0.3275911, %v930_v49  ;;  %v944_v52 = vsub.f32 0.0, %v930_v49 }
 0x483   : > { %v932_v51 = vadd.f32 1.0, %v931_v50  ;;  %v945_v53 = vmul.f32 %v944_v52, %v930_v49 }
 0x485   : > { %1548 = vrcp.f32 %v932_v51  ;;  %v946_v55 = vmul.f32 1.442695, %v945_v53 }
 0x487   : > { %1550 = vpow2.f32 %v946_v55 }
 0x492   : > { %v1549_v54 = vpop.eup %1548 }
 0x493   : > { %v935_v56 = vmul.f32 1.0614054, %v1549_v54 }
 0x494   : > { %v1551_v5 = vpop.eup %1550 }
 0x495   : > { %v936_v57 = vadd.f32 -1.4531521, %v935_v56 }
 0x497   : > { %v937_v58 = vmul.f32 %v1549_v54, %v936_v57 }
 0x499   : > { %v938_v59 = vadd.f32 1.4214138, %v937_v58 }
 0x49b   : > { %v939_v60 = vmul.f32 %v1549_v54, %v938_v59 }
 0x49d   : > { %v940_v61 = vadd.f32 -0.28449672, %v939_v60 }
 0x49f   : > { %v941_v62 = vmul.f32 %v1549_v54, %v940_v61 }
 0x4a1   : > { %v942_v63 = vadd.f32 0.2548296, %v941_v62 }
 0x4a3   : > { %v943_v2 = vmul.f32 %v1549_v54, %v942_v63 }
 0x4a5   : > { %v948_v7 = vmul.f32 %v1551_v5, %v943_v2 }
 0x4a7   : > { %v949_v8 = vsub.f32 1.0, %v948_v7 }
 0x4a9   : > { %v951_v9 = vsub.f32 0.0, %v949_v8 }
 0x4ab   : > { %v952_v10 = vsel %vm950_vm6, %v949_v8, %v951_v9 }
 0x4ac   : > { %v953_v12 = vadd.f32 1.0, %v952_v10 }
 0x4ae   : > { %v954_v13 = vmul.f32 %v953_v12, %v928_v11 }
 0x4b0   : > { %v2089_v15 = vadd.f32 %v954_v13, %v2072_v18  ;;  %v1057_v18 = vld [vmem:[#allocation8 + $0x8] sm:$0xf] }
 0x4b2   : > { %v956_v16 = vmul.f32 %v2030_v4, %v2089_v15 }
 0x4b4   : > { %974 = vrot.lane.b32.xlu0 %v956_v16, %s1815_s22  ;;  %959 = vrot.lane.b32.xlu1 %v956_v16, %s1816_s3  ;;  %v972_v27 = vmul.f32 %v970_v14, %v956_v16  ;;  %s1207_s22 = scalar_lea.sflag [#allocation4], %s447_s12  ;;  %s1720_s3 = scalar_lea.vmem %s1221_s18, 64 }
 0x4b5   : > { %p1721_p4 = scmp.ne.s32.totalorder %s1221_s18, %s1720_s3  ;;  %p1728_p7 = scmp.lt.s32.totalorder %s1726_s30, %s1720_s3 }
 0x4b7   : > { %p1722_p9 = pnand %p1721_p4, %p1911_p5  ;;  %p1729_p11 = por %p1728_p7, %p1727_p13 }
 0x4b8   : > { %986 = vperm.xlu1 %1526, %v983_v17   ;;  %1023 = vperm.xlu0 %1527, %v993_v19  }
 0x4b9   : > { %p1723_p8 = pneg %p1722_p9 }
 0x4bb   : > { %p1730_p0 = pnand %p1729_p11, %p1723_p8 }
 0x4bc   : > { %1017 = vperm.xlu1 %1526, %v991_v20   ;;  %1172 = vperm.xlu0 %1527, %v1376_v21  }
 0x4c0   : > { %1060 = vperm.xlu1 %1526, %v1057_v18  }
 0x4c4   : > { %1166 = vperm.xlu1 %1526, %v1375_v22  }
 0x526   : > { %v960_v25 = vpop.permute.xlu1 %959  ;;  %v975_v28 = vpop.permute.xlu0 %974 }
 0x527   : > { %v966_v26 = vmul.f32 %v964_v3, %v960_v25  ;;  %v980_v30 = vmul.f32 %v978_v24, %v975_v28  ;;  %v1055_v3 = vld [vmem:[#allocation7 + $0x8] sm:$0xf] }
 0x529   : > { %v973_v29 = vadd.f32 %v972_v27, %v966_v26 }
 0x52b   : > { %v981_v31 = vadd.f32 %v980_v30, %v973_v29 }
 0x533   : > { %v987_v32 = vpop.permute.xlu1 %986  ;;  %v1024_v53 = vpop.permute.xlu0 %1023 }
 0x534   : > { %v989_v33 = vadd.f32 %v987_v32, %v981_v31 }
 0x536   : > { %v994_v34 = vsel %vm499_vm1, %v989_v33, 0.0 }
 0x537   : > { %v995_v35 = vrot.slane %v994_v34, 4  ;;  %v1018_v51 = vpop.permute.xlu1 %1017 }
 0x539   : > { %v996_v6 = vadd.f32 %v995_v35, %v994_v34 }
 0x53b   : > { %v997_v36 = vrot.slane %v996_v6, 2  ;;  %v1061_v14 = vpop.permute.xlu1 %1060 }
 0x53d   : > { %v998_v23 = vadd.f32 %v997_v36, %v996_v6 }
 0x53f   : > { %v999_v0 = vrot.slane %v998_v23, 1 }
 0x541   : > { %v1000_v1 = vadd.f32 %v999_v0, %v998_v23 }
 0x543   : > { %v1001_v37 = vmul.f32 0.25, %v1000_v1 }
 0x545   : > { %v1002_v38 = vsub.f32 %v989_v33, %v1001_v37 }
 0x547   : > { %v1003_v39 = vmul.f32 %v1002_v38, %v1002_v38 }
 0x549   : > { %v1004_v40 = vsel %vm499_vm1, %v1003_v39, 0.0 }
 0x54a   : > { %v1005_v41 = vrot.slane %v1004_v40, 4 }
 0x54c   : > { %v1006_v42 = vadd.f32 %v1005_v41, %v1004_v40 }
 0x54e   : > { %v1007_v43 = vrot.slane %v1006_v42, 2 }
 0x550   : > { %v1008_v44 = vadd.f32 %v1007_v43, %v1006_v42 }
 0x552   : > { %v1009_v45 = vrot.slane %v1008_v44, 1 }
 0x554   : > { %v1010_v46 = vadd.f32 %v1009_v45, %v1008_v44  ;;  %v1167_v44 = vpop.permute.xlu1 %1166 }
 0x556   : > { %v1011_v47 = vmul.f32 0.25, %v1010_v46  ;;  %v1173_v46 = vpop.permute.xlu0 %1172 }
 0x558   : > { %v1012_v48 = vadd.f32 1e-05, %v1011_v47 }
 0x55a   : > { %1552 = vrsqrt.f32 %v1012_v48 }
 0x567   : > { %v1553_v49 = vpop.eup %1552 }
 0x568   : > { %v1014_v50 = vmul.f32 %v1553_v49, %v1002_v38 }
 0x56a   : > { %v1020_v52 = vmul.f32 %v1018_v51, %v1014_v50 }
 0x56c   : > { %v1026_v54 = vadd.f32 %v1024_v53, %v1020_v52 }
 0x56e   : > { %v1028_v55 = vmul.f32 0.70710677, %v1026_v54  ;;  %v1027_v21 = vmul.f32 0.5, %v1026_v54 }
 0x570   : > { %v1029_v56 = vand.u32 2147483647, %v1028_v55  ;;  %vm1049_vm7 = vcmp.ge.f32.partialorder %v1028_v55, 0.0 }
 0x572   : > { %v1030_v57 = vmul.f32 0.3275911, %v1029_v56  ;;  %v1043_v59 = vsub.f32 0.0, %v1029_v56 }
 0x574   : > { %v1031_v58 = vadd.f32 1.0, %v1030_v57  ;;  %v1044_v60 = vmul.f32 %v1043_v59, %v1029_v56 }
 0x576   : > { %1554 = vrcp.f32 %v1031_v58  ;;  %v1045_v63 = vmul.f32 1.442695, %v1044_v60 }
 0x578   : > { %1556 = vpow2.f32 %v1045_v63 }
 0x583   : > { %v1555_v61 = vpop.eup %1554 }
 0x584   : > { %v1034_v62 = vmul.f32 1.0614054, %v1555_v61 }
 0x585   : > { %v1557_v13 = vpop.eup %1556 }
 0x586   : > { %v1035_v2 = vadd.f32 -1.4531521, %v1034_v62 }
 0x588   : > { %v1036_v5 = vmul.f32 %v1555_v61, %v1035_v2 }
 0x58a   : > { %v1037_v7 = vadd.f32 1.4214138, %v1036_v5 }
 0x58c   : > { %v1038_v8 = vmul.f32 %v1555_v61, %v1037_v7 }
 0x58e   : > { %v1039_v9 = vadd.f32 -0.28449672, %v1038_v8 }
 0x590   : > { %v1040_v10 = vmul.f32 %v1555_v61, %v1039_v9 }
 0x592   : > { %v1041_v11 = vadd.f32 0.2548296, %v1040_v10 }
 0x594   : > { %v1042_v12 = vmul.f32 %v1555_v61, %v1041_v11 }
 0x596   : > { %v1047_v16 = vmul.f32 %v1557_v13, %v1042_v12 }
 0x598   : > { %v1048_v17 = vsub.f32 1.0, %v1047_v16 }
 0x59a   : > { %v1050_v19 = vsub.f32 0.0, %v1048_v17 }
 0x59c   : > { %v1051_v20 = vsel %vm1049_vm7, %v1048_v17, %v1050_v19 }
 0x59d   : > { %v1052_v18 = vadd.f32 1.0, %v1051_v20 }
 0x59f   : > { %v1053_v22 = vmul.f32 %v1052_v18, %v1027_v21 }
 0x5a1   : > { %1398 = vmatpush3.msk.msra.mxu0 %vm499_vm1, %v1053_v22 }
 0x5a2   : > { %1400 = vmatmul.mubr.msk.f32.vlgmr.msra.gmra.mxu0 %vm568_vm3, %v1055_v3 }
 0x662   : > { %v1135_v24 = vpop.f32.mrf.mxu0 }
 0x663   : > { %v1136_v25 = vadd.f32 %v1135_v24, %v1061_v14 }
 0x664   : > { %v1401_v26 = vpop.f32.mrf.mxu0 }
 0x665   : > { %v1143_v27 = vsel %vm499_vm1, %v1136_v25, 0.0 }
 0x666   : > { %v1144_v28 = vrot.slane %v1143_v27, 4 }
 0x668   : > { %v1145_v29 = vadd.f32 %v1144_v28, %v1143_v27 }
 0x66a   : > { %v1146_v30 = vrot.slane %v1145_v29, 2 }
 0x66c   : > { %v1147_v31 = vadd.f32 %v1146_v30, %v1145_v29 }
 0x66e   : > { %v1148_v32 = vrot.slane %v1147_v31, 1 }
 0x670   : > { %v1149_v33 = vadd.f32 %v1148_v32, %v1147_v31 }
 0x672   : > { %v1150_v34 = vmul.f32 0.25, %v1149_v33 }
 0x674   : > { %v1151_v35 = vsub.f32 %v1136_v25, %v1150_v34 }
 0x676   : > { %v1152_v6 = vmul.f32 %v1151_v35, %v1151_v35 }
 0x678   : > { %v1153_v36 = vsel %vm499_vm1, %v1152_v6, 0.0 }
 0x679   : > { %v1154_v23 = vrot.slane %v1153_v36, 4 }
 0x67b   : > { %v1155_v0 = vadd.f32 %v1154_v23, %v1153_v36 }
 0x67d   : > { %v1156_v1 = vrot.slane %v1155_v0, 2 }
 0x67f   : > { %v1157_v37 = vadd.f32 %v1156_v1, %v1155_v0 }
 0x681   : > { %v1158_v38 = vrot.slane %v1157_v37, 1 }
 0x683   : > { %v1159_v39 = vadd.f32 %v1158_v38, %v1157_v37 }
 0x685   : > { %v1160_v40 = vmul.f32 0.25, %v1159_v39 }
 0x687   : > { %v1161_v41 = vadd.f32 1e-05, %v1160_v40 }
 0x689   : > { %1558 = vrsqrt.f32 %v1161_v41 }
 0x696   : > { %v1559_v42 = vpop.eup %1558 }
 0x697   : > { %v1163_v43 = vmul.f32 %v1559_v42, %v1151_v35 }
 0x699   : > { %v1169_v45 = vmul.f32 %v1167_v44, %v1163_v43 }
 0x69b   : > { %v1175_v47 = vadd.f32 %v1173_v46, %v1169_v45 }
 0x69d   : > { %v1177_v48 = vmul.f32 0.70710677, %v1175_v47  ;;  %v1176_v11 = vmul.f32 0.5, %v1175_v47 }
 0x69f   : > { %v1178_v49 = vand.u32 2147483647, %v1177_v48  ;;  %vm1198_vm8 = vcmp.ge.f32.partialorder %v1177_v48, 0.0 }
 0x6a1   : > { %v1179_v50 = vmul.f32 0.3275911, %v1178_v49  ;;  %v1192_v52 = vsub.f32 0.0, %v1178_v49 }
 0x6a3   : > { %v1180_v51 = vadd.f32 1.0, %v1179_v50  ;;  %v1193_v53 = vmul.f32 %v1192_v52, %v1178_v49 }
 0x6a5   : > { %1560 = vrcp.f32 %v1180_v51  ;;  %v1194_v56 = vmul.f32 1.442695, %v1193_v53 }
 0x6a7   : > { %1562 = vpow2.f32 %v1194_v56 }
 0x6b2   : > { %v1561_v54 = vpop.eup %1560 }
 0x6b3   : > { %v1183_v55 = vmul.f32 1.0614054, %v1561_v54 }
 0x6b4   : > { %v1563_v5 = vpop.eup %1562 }
 0x6b5   : > { %v1184_v57 = vadd.f32 -1.4531521, %v1183_v55 }
 0x6b7   : > { %v1185_v58 = vmul.f32 %v1561_v54, %v1184_v57 }
 0x6b9   : > { %v1186_v59 = vadd.f32 1.4214138, %v1185_v58 }
 0x6bb   : > { %v1187_v60 = vmul.f32 %v1561_v54, %v1186_v59 }
 0x6bd   : > { %v1188_v61 = vadd.f32 -0.28449672, %v1187_v60 }
 0x6bf   : > { %v1189_v62 = vmul.f32 %v1561_v54, %v1188_v61 }
 0x6c1   : > { %v1190_v63 = vadd.f32 0.2548296, %v1189_v62 }
 0x6c3   : > { %v1191_v2 = vmul.f32 %v1561_v54, %v1190_v63 }
 0x6c5   : > { %v1196_v7 = vmul.f32 %v1563_v5, %v1191_v2 }
 0x6c7   : > { %v1197_v8 = vsub.f32 1.0, %v1196_v7 }
 0x6c9   : > { %v1199_v9 = vsub.f32 0.0, %v1197_v8 }
 0x6cb   : > { %v1200_v10 = vsel %vm1198_vm8, %v1197_v8, %v1199_v9 }
 0x6cc   : > { %v1201_v12 = vadd.f32 1.0, %v1200_v10 }
 0x6ce   : > { %v1202_v13 = vmul.f32 %v1201_v12, %v1176_v11 }
 0x6d0   : > { %v1203_v16 = vadd.f32 %v1202_v13, %v2089_v15 }
 0x6d2   : > { %v1204_v17 = vmul.f32 %v2030_v4, %v1203_v16 }
 0x6d4   : > { %1205 = vst [vmem:[%s449_s28] sm:$0xf] %v1204_v17 }
 0x6d5   : > { %1733 = shalt.err (!%p1730_p0)
}
 0x6d6   : > { %s1734_s29 = scalar_lea.hbm %s1218_s27, 64  ;;  %s1738_s20 = scalar_lea.hbm %s2151_s10, 128 }
 0x6d7   : > { %p1735_p3 = scmp.ne.s32.totalorder %s1218_s27, %s1734_s29  ;;  %p1739_p1 = scmp.lt.s32.totalorder %s1218_s27, %s2151_s10 }
 0x6d8   : > { %p1740_p2 = scmp.lt.s32.totalorder %s1738_s20, %s1734_s29 }
 0x6d9   : > { %p1736_p12 = pnand %p1735_p3, %p1911_p5 }
 0x6da   : > { %p1741_p4 = por %p1740_p2, %p1739_p1 }
 0x6db   : > { %p1737_p10 = pneg %p1736_p12 }
 0x6dd   : > { %p1742_p9 = pnand %p1741_p4, %p1737_p10 }
 0x6df   : > { %1745 = shalt.err (!%p1742_p9)
}
 0x6e0   : > { %1426 = dma.vmem_to_hbm [thread:$0]  (%p1911_p5), %s1221_s18, 64, %s1218_s27, %s1207_s22  }
 0x6e1 PF: > { %p1463_p8 = scmp.ge.s32.totalorder %s1796_s16, 2  ;;  %s1232_s21 = sand.u32 1, %s1784_s13  }
 0x6e2   : > { %s1233_s26 = scalar_lea.sflag [#allocation4], %s1232_s21 }
 0x6e3   : > { %p1448_p13 = pnand %p1463_p8, %p1915_p6 }
 0x6e5   : > { %p1449_p7 = pneg %p1448_p13 }
 0x6e7   : > { %1779 = dma.done.wait (%p1449_p7), %s1233_s26, 64  }
 0x6e8   : > { %1781 = vsyncadd (%p1449_p7), %s1233_s26, 4294967232  ;;  %s2171_s3 = sld [smem:[#allocation19_spill]]  ;;  %p24_p11 = scmp.ge.s32.totalorder %s1898_s19, 4  }
 0x6e9   : > { %s2172_s15 = sld [smem:[#allocation20_spill]]  ;;  %s2173_s13 = smov %s1788_s14 }
 0x6ea   : > { %s2175_s16 = smov %s1898_s19  ;;  %26 = sbr.rel (!%p24_p11) target bundleno = 9 (0x9), region = 139 }
 0x6ee   : > { %s2174_s14 = smov %s2171_s3 }
 0x6ef   :  { %1238 = vsyncpa [#allocation3], 1 }
 0x6f0   :  { %1240 = vsyncpa [#allocation3 + $0x1], 1 }
 0x6f1   :  { %1241 = vsyncpa [#allocation6], 1 }
 0x6f2   :  { %1242 = vsyncpa [#allocation9], 1 }
 0x6f3   :  { %1243 = vsyncpa [#allocation12], 1 }
 0x6f4   :  { %1244 = vsyncpa [#allocation4], 1 }
 0x6f5   :  { %1246 = vsyncpa [#allocation4 + $0x1], 1 }

</bundles_post_ra>
